<compile_context>
chip_gen: v7x
topology: tpu7x:2x2x1
jax: 0.10.0
libtpu: 0.0.40
codegen_flags: <defaults>
</compile_context>

<pallas_src>
import functools

import jax
import jax.numpy as jnp
from jax.experimental import pallas as pl
from jax.experimental.pallas import tpu as pltpu


def _round_up(x, m):
    return (x + m - 1) // m * m


def _pad2(x, rows, cols, dtype):
    x = jnp.pad(x, ((0, rows - x.shape[0]), (0, cols - x.shape[1])))
    return x.astype(dtype)


# ---------------------------------------------------------------------------
# Fused kernel: one-hot-counts embedding mean + fc1 per batch tile,
# full-batch BatchNorm + ReLU + fc2 on the last tile.
# ---------------------------------------------------------------------------
def _fasttext_kernel(ids_ref, embed_ref, w1_ref, b1_ref, gamma_ref, beta_ref,
                     w2_ref, b2_ref, out_ref, h_scratch, *, TB, S, eps):
    bt = pl.program_id(0)
    b0 = pl.multiple_of(bt * TB, TB)

    # ---- bag-of-words token counts (VPU compares; no DMA, no scalar loop) ----
    ids = ids_ref[...]                                          # (TB, S) int32
    Vp = embed_ref.shape[0]
    vocab_iota = jax.lax.broadcasted_iota(jnp.int32, (TB, Vp), 1)
    counts = jnp.zeros((TB, Vp), jnp.float32)
    for s in range(S):                                          # S is small & static
        counts = counts + (ids[:, s:s + 1] == vocab_iota).astype(jnp.float32)

    # ---- embedding sum and fc1 on the MXU (1/S already folded into w1) ----
    emb_sum = jnp.dot(counts.astype(jnp.bfloat16), embed_ref[...],
                      preferred_element_type=jnp.float32)       # (TB, Dp) f32
    h_tile = jnp.dot(emb_sum.astype(jnp.bfloat16), w1_ref[...],
                     preferred_element_type=jnp.float32) + b1_ref[...]
    h_scratch[pl.ds(b0, TB), :] = h_tile                        # persists across grid

    # ---- last tile: exact full-batch BatchNorm1d (train mode) + ReLU + fc2 ----
    @pl.when(bt == pl.num_programs(0) - 1)
    def _():
        h = h_scratch[...]                                      # (B, Hp) f32
        mu = jnp.mean(h, axis=0, keepdims=True)
        var = jnp.mean((h - mu) ** 2, axis=0, keepdims=True)    # biased (PyTorch train)
        hn = (h - mu) * jax.lax.rsqrt(var + eps) * gamma_ref[...] + beta_ref[...]
        hr = jnp.maximum(hn, 0.0)
        out_ref[...] = (jnp.dot(hr.astype(jnp.bfloat16), w2_ref[...],
                                preferred_element_type=jnp.float32) + b2_ref[...])


# ---------------------------------------------------------------------------
# Wrapper: pad/cast once (outside the hot path), then one pallas_call.
# ---------------------------------------------------------------------------
def prepare_params(embed, w1, b1, gamma, beta, w2, b2, *, seq_len):
    """Pad feature dims to multiples of 128 (lane-dense, mathematically exact)
    and cast matmul weights to bf16. Call ONCE, outside the per-step hot path."""
    V, D = embed.shape
    H = w1.shape[1]
    L = w2.shape[1]
    Vp, Dp = _round_up(V, 128), _round_up(D, 128)
    Hp, Lp = _round_up(H, 128), _round_up(L, 128)
    return {
        "embed": _pad2(embed, Vp, Dp, jnp.bfloat16),
        "w1": _pad2(w1 * (1.0 / seq_len), Dp, Hp, jnp.bfloat16),  # fold seq-mean scale
        "b1": _pad2(b1.reshape(1, -1), 1, Hp, jnp.float32),
        "gamma": _pad2(gamma.reshape(1, -1), 1, Hp, jnp.float32),
        "beta": _pad2(beta.reshape(1, -1), 1, Hp, jnp.float32),
        "w2": _pad2(w2, Hp, Lp, jnp.bfloat16),
        "b2": _pad2(b2.reshape(1, -1), 1, Lp, jnp.float32),
    }


def fasttext_forward(ids, params, *, label_size, eps=1e-5):
    B, S = ids.shape
    Vp, Dp = params["embed"].shape
    Hp = params["w1"].shape[1]
    Lp = params["w2"].shape[1]

    # Largest batch tile <= 128 that is a multiple of 8 and divides B; else whole batch.
    TB = B
    for tb in (128, 64, 32, 16, 8):
        if tb <= B and B % tb == 0:
            TB = tb
            break
    nt = B // TB

    kernel = functools.partial(_fasttext_kernel, TB=TB, S=S, eps=eps)
    out = pl.pallas_call(
        kernel,
        out_shape=jax.ShapeDtypeStruct((B, Lp), jnp.float32),
        grid=(nt,),
        in_specs=[
            pl.BlockSpec((TB, S), lambda bt: (bt, 0)),      # ids, per batch tile
            pl.BlockSpec((Vp, Dp), lambda bt: (0, 0)),      # embed (VMEM resident)
            pl.BlockSpec((Dp, Hp), lambda bt: (0, 0)),      # w1 (pre-scaled by 1/S)
            pl.BlockSpec((1, Hp), lambda bt: (0, 0)),       # b1
            pl.BlockSpec((1, Hp), lambda bt: (0, 0)),       # gamma
            pl.BlockSpec((1, Hp), lambda bt: (0, 0)),       # beta
            pl.BlockSpec((Hp, Lp), lambda bt: (0, 0)),      # w2
            pl.BlockSpec((1, Lp), lambda bt: (0, 0)),       # b2
        ],
        out_specs=pl.BlockSpec((B, Lp), lambda bt: (0, 0)),  # resident, written last step
        scratch_shapes=[pltpu.VMEM((B, Hp), jnp.float32)],   # h, persists across tiles
        compiler_params=pltpu.CompilerParams(
            # batch axis must be sequential: h scratch + full-batch BN on last tile
            dimension_semantics=("arbitrary",)),
    )(ids.astype(jnp.int32), params["embed"], params["w1"], params["b1"],
      params["gamma"], params["beta"], params["w2"], params["b2"])

    return out[:, :label_size]


if __name__ == "__main__":
    # Small shapes consistent with the module:
    # batch=32, seq=16, vocab=256, vec_dim=64, hidden_size=64, label_size=8
    B, S, V, D, H, L = 32, 16, 256, 64, 64, 8

    key = jax.random.PRNGKey(0)
    k = jax.random.split(key, 6)
    ids = jax.random.randint(k[0], (B, S), 0, V, dtype=jnp.int32)
    embed = jax.random.normal(k[1], (V, D), jnp.float32)      # stand-in for vocab.vectors
    w1 = jax.random.normal(k[2], (D, H), jnp.float32) * 0.1
    b1 = jax.random.normal(k[3], (H,), jnp.float32) * 0.1
    gamma = jnp.ones((H,), jnp.float32)                       # BatchNorm1d weight init
    beta = jnp.zeros((H,), jnp.float32)                       # BatchNorm1d bias init
    w2 = jax.random.normal(k[4], (H, L), jnp.float32) * 0.1
    b2 = jax.random.normal(k[5], (L,), jnp.float32) * 0.1

    params = prepare_params(embed, w1, b1, gamma, beta, w2, b2, seq_len=S)
    out = fasttext_forward(ids, params, label_size=L)
    out = jax.block_until_ready(out)

    # Pure-JAX mixed-precision reference (mirrors the kernel's bf16 weight /
    # activation rounding; accumulation stays f32 in both).
    bf = lambda x: x.astype(jnp.bfloat16).astype(jnp.float32)
    x = bf(embed)[ids]                                        # (B, S, D)
    s_emb = jnp.sum(x, axis=1)                                # (B, D)
    h = bf(s_emb) @ bf(w1 * (1.0 / S)) + b1
    mu = jnp.mean(h, axis=0, keepdims=True)
    var = jnp.mean((h - mu) ** 2, axis=0, keepdims=True)
    hn = (h - mu) / jnp.sqrt(var + 1e-5) * gamma + beta
    ref = bf(jnp.maximum(hn, 0.0)) @ bf(w2) + b2

    assert out.shape == (B, L)
    assert jnp.allclose(out, ref, atol=2e-2, rtol=2e-2), "mismatch vs reference"
    print("KERNEL_OK")
</pallas_src>

<mosaic_0001>
module attributes {stable_mosaic.version = 11 : i64} {
  func.func @_fasttext_kernel(%arg0: i32, %arg1: memref<32x16xi32, #tpu.memory_space<vmem>>, %arg2: memref<256x128xbf16, #tpu.memory_space<vmem>>, %arg3: memref<128x128xbf16, #tpu.memory_space<vmem>>, %arg4: memref<1x128xf32, #tpu.memory_space<vmem>>, %arg5: memref<1x128xf32, #tpu.memory_space<vmem>>, %arg6: memref<1x128xf32, #tpu.memory_space<vmem>>, %arg7: memref<128x128xbf16, #tpu.memory_space<vmem>>, %arg8: memref<1x128xf32, #tpu.memory_space<vmem>>, %arg9: memref<32x128xf32, #tpu.memory_space<vmem>>, %arg10: memref<32x128xf32, #tpu.memory_space<vmem>>) attributes {dimension_semantics = [#tpu.dimension_semantics<arbitrary>], iteration_bounds = array<i64: 1>, scalar_prefetch = 0 : i64, scratch_operands = 1 : i64, tpu.core_type = #tpu.core_type<tc>, window_params = [{transform_indices = @transform_0, window_bounds = array<i64: 32, 16>}, {pipeline_mode = #tpu.pipeline_mode<synchronous>, transform_indices = @transform_1, window_bounds = array<i64: 256, 128>}, {pipeline_mode = #tpu.pipeline_mode<synchronous>, transform_indices = @transform_2, window_bounds = array<i64: 128, 128>}, {pipeline_mode = #tpu.pipeline_mode<synchronous>, transform_indices = @transform_3, window_bounds = array<i64: 1, 128>}, {pipeline_mode = #tpu.pipeline_mode<synchronous>, transform_indices = @transform_4, window_bounds = array<i64: 1, 128>}, {pipeline_mode = #tpu.pipeline_mode<synchronous>, transform_indices = @transform_5, window_bounds = array<i64: 1, 128>}, {pipeline_mode = #tpu.pipeline_mode<synchronous>, transform_indices = @transform_6, window_bounds = array<i64: 128, 128>}, {pipeline_mode = #tpu.pipeline_mode<synchronous>, transform_indices = @transform_7, window_bounds = array<i64: 1, 128>}, {pipeline_mode = #tpu.pipeline_mode<synchronous>, transform_indices = @transform_8, window_bounds = array<i64: 32, 128>}]} {
    %c32_i32 = arith.constant 32 : i32
    %0 = arith.muli %arg0, %c32_i32 : i32
    %1 = tpu.assume_multiple %0, 32 : i32
    %c0 = arith.constant 0 : index
    %c0_0 = arith.constant 0 : index
    %2 = vector.load %arg1[%c0, %c0_0] : memref<32x16xi32, #tpu.memory_space<vmem>>, vector<32x16xi32>
    %3 = tpu.iota {dimensions = array<i32: 1>} : vector<32x256xi32>
    %cst = arith.constant 0.000000e+00 : f32
    %4 = vector.broadcast %cst : f32 to vector<32x256xf32>
    %5 = vector.extract_strided_slice %2 {offsets = [0, 0], sizes = [32, 1], strides = [1, 1]} : vector<32x16xi32> to vector<32x1xi32>
    %6 = vector.broadcast %5 : vector<32x1xi32> to vector<32x256xi32>
    %7 = arith.cmpi eq, %6, %3 : vector<32x256xi32>
    %8 = arith.extui %7 : vector<32x256xi1> to vector<32x256xi32>
    %9 = arith.sitofp %8 : vector<32x256xi32> to vector<32x256xf32>
    %10 = arith.addf %4, %9 : vector<32x256xf32>
    %11 = vector.extract_strided_slice %2 {offsets = [0, 1], sizes = [32, 1], strides = [1, 1]} : vector<32x16xi32> to vector<32x1xi32>
    %12 = vector.broadcast %11 : vector<32x1xi32> to vector<32x256xi32>
    %13 = arith.cmpi eq, %12, %3 : vector<32x256xi32>
    %14 = arith.extui %13 : vector<32x256xi1> to vector<32x256xi32>
    %15 = arith.sitofp %14 : vector<32x256xi32> to vector<32x256xf32>
    %16 = arith.addf %10, %15 : vector<32x256xf32>
    %17 = vector.extract_strided_slice %2 {offsets = [0, 2], sizes = [32, 1], strides = [1, 1]} : vector<32x16xi32> to vector<32x1xi32>
    %18 = vector.broadcast %17 : vector<32x1xi32> to vector<32x256xi32>
    %19 = arith.cmpi eq, %18, %3 : vector<32x256xi32>
    %20 = arith.extui %19 : vector<32x256xi1> to vector<32x256xi32>
    %21 = arith.sitofp %20 : vector<32x256xi32> to vector<32x256xf32>
    %22 = arith.addf %16, %21 : vector<32x256xf32>
    %23 = vector.extract_strided_slice %2 {offsets = [0, 3], sizes = [32, 1], strides = [1, 1]} : vector<32x16xi32> to vector<32x1xi32>
    %24 = vector.broadcast %23 : vector<32x1xi32> to vector<32x256xi32>
    %25 = arith.cmpi eq, %24, %3 : vector<32x256xi32>
    %26 = arith.extui %25 : vector<32x256xi1> to vector<32x256xi32>
    %27 = arith.sitofp %26 : vector<32x256xi32> to vector<32x256xf32>
    %28 = arith.addf %22, %27 : vector<32x256xf32>
    %29 = vector.extract_strided_slice %2 {offsets = [0, 4], sizes = [32, 1], strides = [1, 1]} : vector<32x16xi32> to vector<32x1xi32>
    %30 = vector.broadcast %29 : vector<32x1xi32> to vector<32x256xi32>
    %31 = arith.cmpi eq, %30, %3 : vector<32x256xi32>
    %32 = arith.extui %31 : vector<32x256xi1> to vector<32x256xi32>
    %33 = arith.sitofp %32 : vector<32x256xi32> to vector<32x256xf32>
    %34 = arith.addf %28, %33 : vector<32x256xf32>
    %35 = vector.extract_strided_slice %2 {offsets = [0, 5], sizes = [32, 1], strides = [1, 1]} : vector<32x16xi32> to vector<32x1xi32>
    %36 = vector.broadcast %35 : vector<32x1xi32> to vector<32x256xi32>
    %37 = arith.cmpi eq, %36, %3 : vector<32x256xi32>
    %38 = arith.extui %37 : vector<32x256xi1> to vector<32x256xi32>
    %39 = arith.sitofp %38 : vector<32x256xi32> to vector<32x256xf32>
    %40 = arith.addf %34, %39 : vector<32x256xf32>
    %41 = vector.extract_strided_slice %2 {offsets = [0, 6], sizes = [32, 1], strides = [1, 1]} : vector<32x16xi32> to vector<32x1xi32>
    %42 = vector.broadcast %41 : vector<32x1xi32> to vector<32x256xi32>
    %43 = arith.cmpi eq, %42, %3 : vector<32x256xi32>
    %44 = arith.extui %43 : vector<32x256xi1> to vector<32x256xi32>
    %45 = arith.sitofp %44 : vector<32x256xi32> to vector<32x256xf32>
    %46 = arith.addf %40, %45 : vector<32x256xf32>
    %47 = vector.extract_strided_slice %2 {offsets = [0, 7], sizes = [32, 1], strides = [1, 1]} : vector<32x16xi32> to vector<32x1xi32>
    %48 = vector.broadcast %47 : vector<32x1xi32> to vector<32x256xi32>
    %49 = arith.cmpi eq, %48, %3 : vector<32x256xi32>
    %50 = arith.extui %49 : vector<32x256xi1> to vector<32x256xi32>
    %51 = arith.sitofp %50 : vector<32x256xi32> to vector<32x256xf32>
    %52 = arith.addf %46, %51 : vector<32x256xf32>
    %53 = vector.extract_strided_slice %2 {offsets = [0, 8], sizes = [32, 1], strides = [1, 1]} : vector<32x16xi32> to vector<32x1xi32>
    %54 = vector.broadcast %53 : vector<32x1xi32> to vector<32x256xi32>
    %55 = arith.cmpi eq, %54, %3 : vector<32x256xi32>
    %56 = arith.extui %55 : vector<32x256xi1> to vector<32x256xi32>
    %57 = arith.sitofp %56 : vector<32x256xi32> to vector<32x256xf32>
    %58 = arith.addf %52, %57 : vector<32x256xf32>
    %59 = vector.extract_strided_slice %2 {offsets = [0, 9], sizes = [32, 1], strides = [1, 1]} : vector<32x16xi32> to vector<32x1xi32>
    %60 = vector.broadcast %59 : vector<32x1xi32> to vector<32x256xi32>
    %61 = arith.cmpi eq, %60, %3 : vector<32x256xi32>
    %62 = arith.extui %61 : vector<32x256xi1> to vector<32x256xi32>
    %63 = arith.sitofp %62 : vector<32x256xi32> to vector<32x256xf32>
    %64 = arith.addf %58, %63 : vector<32x256xf32>
    %65 = vector.extract_strided_slice %2 {offsets = [0, 10], sizes = [32, 1], strides = [1, 1]} : vector<32x16xi32> to vector<32x1xi32>
    %66 = vector.broadcast %65 : vector<32x1xi32> to vector<32x256xi32>
    %67 = arith.cmpi eq, %66, %3 : vector<32x256xi32>
    %68 = arith.extui %67 : vector<32x256xi1> to vector<32x256xi32>
    %69 = arith.sitofp %68 : vector<32x256xi32> to vector<32x256xf32>
    %70 = arith.addf %64, %69 : vector<32x256xf32>
    %71 = vector.extract_strided_slice %2 {offsets = [0, 11], sizes = [32, 1], strides = [1, 1]} : vector<32x16xi32> to vector<32x1xi32>
    %72 = vector.broadcast %71 : vector<32x1xi32> to vector<32x256xi32>
    %73 = arith.cmpi eq, %72, %3 : vector<32x256xi32>
    %74 = arith.extui %73 : vector<32x256xi1> to vector<32x256xi32>
    %75 = arith.sitofp %74 : vector<32x256xi32> to vector<32x256xf32>
    %76 = arith.addf %70, %75 : vector<32x256xf32>
    %77 = vector.extract_strided_slice %2 {offsets = [0, 12], sizes = [32, 1], strides = [1, 1]} : vector<32x16xi32> to vector<32x1xi32>
    %78 = vector.broadcast %77 : vector<32x1xi32> to vector<32x256xi32>
    %79 = arith.cmpi eq, %78, %3 : vector<32x256xi32>
    %80 = arith.extui %79 : vector<32x256xi1> to vector<32x256xi32>
    %81 = arith.sitofp %80 : vector<32x256xi32> to vector<32x256xf32>
    %82 = arith.addf %76, %81 : vector<32x256xf32>
    %83 = vector.extract_strided_slice %2 {offsets = [0, 13], sizes = [32, 1], strides = [1, 1]} : vector<32x16xi32> to vector<32x1xi32>
    %84 = vector.broadcast %83 : vector<32x1xi32> to vector<32x256xi32>
    %85 = arith.cmpi eq, %84, %3 : vector<32x256xi32>
    %86 = arith.extui %85 : vector<32x256xi1> to vector<32x256xi32>
    %87 = arith.sitofp %86 : vector<32x256xi32> to vector<32x256xf32>
    %88 = arith.addf %82, %87 : vector<32x256xf32>
    %89 = vector.extract_strided_slice %2 {offsets = [0, 14], sizes = [32, 1], strides = [1, 1]} : vector<32x16xi32> to vector<32x1xi32>
    %90 = vector.broadcast %89 : vector<32x1xi32> to vector<32x256xi32>
    %91 = arith.cmpi eq, %90, %3 : vector<32x256xi32>
    %92 = arith.extui %91 : vector<32x256xi1> to vector<32x256xi32>
    %93 = arith.sitofp %92 : vector<32x256xi32> to vector<32x256xf32>
    %94 = arith.addf %88, %93 : vector<32x256xf32>
    %95 = vector.extract_strided_slice %2 {offsets = [0, 15], sizes = [32, 1], strides = [1, 1]} : vector<32x16xi32> to vector<32x1xi32>
    %96 = vector.broadcast %95 : vector<32x1xi32> to vector<32x256xi32>
    %97 = arith.cmpi eq, %96, %3 : vector<32x256xi32>
    %98 = arith.extui %97 : vector<32x256xi1> to vector<32x256xi32>
    %99 = arith.sitofp %98 : vector<32x256xi32> to vector<32x256xf32>
    %100 = arith.addf %94, %99 : vector<32x256xf32>
    %101 = arith.truncf %100 : vector<32x256xf32> to vector<32x256xbf16>
    %c0_1 = arith.constant 0 : index
    %c0_2 = arith.constant 0 : index
    %102 = vector.load %arg2[%c0_1, %c0_2] : memref<256x128xbf16, #tpu.memory_space<vmem>>, vector<256x128xbf16>
    %cst_3 = arith.constant dense<0.000000e+00> : vector<32x128xf32>
    %103 = tpu.matmul %101, %102, %cst_3 {dimension_numbers = #tpu.dot_dimension_numbers<[1], [0], [0], [1], [0, 0, 1, 1], [], []>} : vector<32x256xbf16>, vector<256x128xbf16>, vector<32x128xf32> -> vector<32x128xf32>
    %104 = arith.truncf %103 : vector<32x128xf32> to vector<32x128xbf16>
    %c0_4 = arith.constant 0 : index
    %c0_5 = arith.constant 0 : index
    %105 = vector.load %arg3[%c0_4, %c0_5] : memref<128x128xbf16, #tpu.memory_space<vmem>>, vector<128x128xbf16>
    %cst_6 = arith.constant dense<0.000000e+00> : vector<32x128xf32>
    %106 = tpu.matmul %104, %105, %cst_6 {dimension_numbers = #tpu.dot_dimension_numbers<[1], [0], [0], [1], [0, 0, 1, 1], [], []>} : vector<32x128xbf16>, vector<128x128xbf16>, vector<32x128xf32> -> vector<32x128xf32>
    %c0_7 = arith.constant 0 : index
    %c0_8 = arith.constant 0 : index
    %107 = vector.load %arg4[%c0_7, %c0_8] : memref<1x128xf32, #tpu.memory_space<vmem>>, vector<1x128xf32>
    %108 = vector.broadcast %107 : vector<1x128xf32> to vector<32x128xf32>
    %109 = arith.addf %106, %108 : vector<32x128xf32>
    %110 = arith.index_cast %1 : i32 to index
    %c0_9 = arith.constant 0 : index
    %111 = vector.load %arg10[%110, %c0_9] : memref<32x128xf32, #tpu.memory_space<vmem>>, vector<32x128xf32>
    tpu.vector_store %arg10[%110, %c0_9], %109 {strides = array<i32>} : memref<32x128xf32, #tpu.memory_space<vmem>>, vector<32x128xf32>,
    %c0_i32 = arith.constant 0 : i32
    %112 = arith.cmpi eq, %arg0, %c0_i32 : i32
    %113 = arith.extui %112 : i1 to i32
    %c0_i32_10 = arith.constant 0 : i32
    %114 = arith.cmpi ne, %113, %c0_i32_10 : i32
    scf.if %114 {
      %c0_11 = arith.constant 0 : index
      %c0_12 = arith.constant 0 : index
      %115 = vector.load %arg10[%c0_11, %c0_12] : memref<32x128xf32, #tpu.memory_space<vmem>>, vector<32x128xf32>
      %cst_13 = arith.constant dense<0.000000e+00> : vector<128xf32>
      %116 = vector.multi_reduction <add>, %115, %cst_13 [0] : vector<32x128xf32> to vector<128xf32>
      %117 = vector.shape_cast %116 : vector<128xf32> to vector<1x128xf32>
      %cst_14 = arith.constant 3.200000e+01 : f32
      %118 = vector.broadcast %cst_14 : f32 to vector<1x128xf32>
      %119 = arith.divf %117, %118 : vector<1x128xf32>
      %120 = vector.broadcast %119 : vector<1x128xf32> to vector<32x128xf32>
      %121 = arith.subf %115, %120 : vector<32x128xf32>
      %122 = arith.mulf %121, %121 : vector<32x128xf32>
      %cst_15 = arith.constant dense<0.000000e+00> : vector<128xf32>
      %123 = vector.multi_reduction <add>, %122, %cst_15 [0] : vector<32x128xf32> to vector<128xf32>
      %124 = vector.shape_cast %123 : vector<128xf32> to vector<1x128xf32>
      %cst_16 = arith.constant 3.200000e+01 : f32
      %125 = vector.broadcast %cst_16 : f32 to vector<1x128xf32>
      %126 = arith.divf %124, %125 : vector<1x128xf32>
      %127 = vector.broadcast %119 : vector<1x128xf32> to vector<32x128xf32>
      %128 = arith.subf %115, %127 : vector<32x128xf32>
      %cst_17 = arith.constant 9.99999974E-6 : f32
      %129 = vector.broadcast %cst_17 : f32 to vector<1x128xf32>
      %130 = arith.addf %126, %129 : vector<1x128xf32>
      %131 = math.rsqrt %130 : vector<1x128xf32>
      %132 = vector.broadcast %131 : vector<1x128xf32> to vector<32x128xf32>
      %133 = arith.mulf %128, %132 : vector<32x128xf32>
      %c0_18 = arith.constant 0 : index
      %c0_19 = arith.constant 0 : index
      %134 = vector.load %arg5[%c0_18, %c0_19] : memref<1x128xf32, #tpu.memory_space<vmem>>, vector<1x128xf32>
      %135 = vector.broadcast %134 : vector<1x128xf32> to vector<32x128xf32>
      %136 = arith.mulf %133, %135 : vector<32x128xf32>
      %c0_20 = arith.constant 0 : index
      %c0_21 = arith.constant 0 : index
      %137 = vector.load %arg6[%c0_20, %c0_21] : memref<1x128xf32, #tpu.memory_space<vmem>>, vector<1x128xf32>
      %138 = vector.broadcast %137 : vector<1x128xf32> to vector<32x128xf32>
      %139 = arith.addf %136, %138 : vector<32x128xf32>
      %cst_22 = arith.constant 0.000000e+00 : f32
      %140 = vector.broadcast %cst_22 : f32 to vector<32x128xf32>
      %141 = arith.maximumf %139, %140 : vector<32x128xf32>
      %142 = arith.truncf %141 : vector<32x128xf32> to vector<32x128xbf16>
      %c0_23 = arith.constant 0 : index
      %c0_24 = arith.constant 0 : index
      %143 = vector.load %arg7[%c0_23, %c0_24] : memref<128x128xbf16, #tpu.memory_space<vmem>>, vector<128x128xbf16>
      %cst_25 = arith.constant dense<0.000000e+00> : vector<32x128xf32>
      %144 = tpu.matmul %142, %143, %cst_25 {dimension_numbers = #tpu.dot_dimension_numbers<[1], [0], [0], [1], [0, 0, 1, 1], [], []>} : vector<32x128xbf16>, vector<128x128xbf16>, vector<32x128xf32> -> vector<32x128xf32>
      %c0_26 = arith.constant 0 : index
      %c0_27 = arith.constant 0 : index
      %145 = vector.load %arg8[%c0_26, %c0_27] : memref<1x128xf32, #tpu.memory_space<vmem>>, vector<1x128xf32>
      %146 = vector.broadcast %145 : vector<1x128xf32> to vector<32x128xf32>
      %147 = arith.addf %144, %146 : vector<32x128xf32>
      %c0_28 = arith.constant 0 : index
      %c0_29 = arith.constant 0 : index
      %148 = vector.load %arg9[%c0_28, %c0_29] : memref<32x128xf32, #tpu.memory_space<vmem>>, vector<32x128xf32>
      tpu.vector_store %arg9[%c0_28, %c0_29], %147 {strides = array<i32>} : memref<32x128xf32, #tpu.memory_space<vmem>>, vector<32x128xf32>,
    } else {
    }
    return
  }
  func.func @transform_0(%arg0: i32) -> (i32, i32) {
    %c0_i32 = arith.constant 0 : i32
    %c0_i32_0 = arith.constant 0 : i32
    return %arg0, %c0_i32 : i32, i32
  }
  func.func @transform_1(%arg0: i32) -> (i32, i32) {
    %c0_i32 = arith.constant 0 : i32
    %c0_i32_0 = arith.constant 0 : i32
    %c0_i32_1 = arith.constant 0 : i32
    return %c0_i32, %c0_i32_0 : i32, i32
  }
  func.func @transform_2(%arg0: i32) -> (i32, i32) {
    %c0_i32 = arith.constant 0 : i32
    %c0_i32_0 = arith.constant 0 : i32
    %c0_i32_1 = arith.constant 0 : i32
    return %c0_i32, %c0_i32_0 : i32, i32
  }
  func.func @transform_3(%arg0: i32) -> (i32, i32) {
    %c0_i32 = arith.constant 0 : i32
    %c0_i32_0 = arith.constant 0 : i32
    %c0_i32_1 = arith.constant 0 : i32
    return %c0_i32, %c0_i32_0 : i32, i32
  }
  func.func @transform_4(%arg0: i32) -> (i32, i32) {
    %c0_i32 = arith.constant 0 : i32
    %c0_i32_0 = arith.constant 0 : i32
    %c0_i32_1 = arith.constant 0 : i32
    return %c0_i32, %c0_i32_0 : i32, i32
  }
  func.func @transform_5(%arg0: i32) -> (i32, i32) {
    %c0_i32 = arith.constant 0 : i32
    %c0_i32_0 = arith.constant 0 : i32
    %c0_i32_1 = arith.constant 0 : i32
    return %c0_i32, %c0_i32_0 : i32, i32
  }
  func.func @transform_6(%arg0: i32) -> (i32, i32) {
    %c0_i32 = arith.constant 0 : i32
    %c0_i32_0 = arith.constant 0 : i32
    %c0_i32_1 = arith.constant 0 : i32
    return %c0_i32, %c0_i32_0 : i32, i32
  }
  func.func @transform_7(%arg0: i32) -> (i32, i32) {
    %c0_i32 = arith.constant 0 : i32
    %c0_i32_0 = arith.constant 0 : i32
    %c0_i32_1 = arith.constant 0 : i32
    return %c0_i32, %c0_i32_0 : i32, i32
  }
  func.func @transform_8(%arg0: i32) -> (i32, i32) {
    %c0_i32 = arith.constant 0 : i32
    %c0_i32_0 = arith.constant 0 : i32
    %c0_i32_1 = arith.constant 0 : i32
    return %c0_i32, %c0_i32_0 : i32, i32
  }
}

</mosaic_0001>

<bundles_post_ra>
// kernel: tpu_custom_call.1
= control target key start
LH: loop header
LB: loop body
LE: loop exit
PB: predicated region body
PF: predicated region fallthrough
CT: control target
= control target key end

     0   :  { %13 = vsyncpa [#allocation4], 0  ;;  %s2375_s0 = inlined_call_operand.vmem [shape: s32[32,16], index: 0, kind: input, shape index: {}]   ;;  %s2376_s1 = inlined_call_operand.hbm [shape: bf16[256,128], index: 1, kind: input, shape index: {}]   ;;  %s2377_s2 = inlined_call_operand.hbm [shape: bf16[128,128], index: 2, kind: input, shape index: {}]   ;;  %s2378_s3 = inlined_call_operand.vmem [shape: f32[1,128], index: 3, kind: input, shape index: {}]   ;;  %s2379_s4 = inlined_call_operand.vmem [shape: f32[1,128], index: 4, kind: input, shape index: {}]   ;;  %s2380_s5 = inlined_call_operand.vmem [shape: f32[1,128], index: 5, kind: input, shape index: {}]   ;;  %s2381_s6 = inlined_call_operand.vmem [shape: bf16[128,128], index: 6, kind: input, shape index: {}]   ;;  %s2382_s7 = inlined_call_operand.vmem [shape: f32[1,128], index: 7, kind: input, shape index: {}]   ;;  %s2383_s8 = inlined_call_operand.hbm [shape: f32[32,128], index: 8, kind: output, shape index: {}]  }
   0x1   :  { %14 = vsyncpa [#allocation7], 0 }
   0x2   :  { %15 = vsyncpa [#allocation5], 0  ;;  %s1723_s27 = smov [#allocation3]   ;;  %s1651_s9 = scalar_lea.hbm %s2376_s1, 2048 }
   0x3   :  { %s23_s28 = sshll.u32 %s1723_s27, 4  ;;  %p1652_p0 = scmp.ne.s32.totalorder %s2376_s1, %s1651_s9  ;;  %s24_s28 = int_to_ptr.vmem [resolvable:$true] %s23_s28 }
   0x4   :  { %p1655_p1 = scmp.lt.u32.totalorder %s1651_s9, %s2376_s1 }
   0x6   :  { %p1657_p2 = pnand %p1655_p1, %p1652_p0 }
   0x8   :  { %1660 = shalt.err (!%p1657_p2)
}
   0x9   :  { %s1661_s14 = scalar_lea.vmem %s24_s28, 2048  ;;  %p1666_p4 = scmp.lt.s32.totalorder %s24_s28, %s24_s28 }
   0xa   :  { %p1662_p3 = scmp.ne.s32.totalorder %s24_s28, %s1661_s14  ;;  %p1667_p5 = scmp.lt.s32.totalorder %s1661_s14, %s1661_s14 }
   0xc   :  { %p1668_p6 = por %p1667_p5, %p1666_p4 }
   0xe   :  { %p1669_p7 = pnand %p1668_p6, %p1662_p3 }
  0x10   :  { %1672 = shalt.err (!%p1669_p7)
}
  0x11   :  { %s1724_s15 = smov 64   ;;  %s1725_s16 = smov 4  }
  0x12   :  { %29 = dma.hbm_to_vmem [thread:$0]  %s2376_s1, 2048, %s24_s28, [#allocation4], %s1724_s15, %s1724_s15, %s1725_s16  }
  0x13   :  { %s1726_s19 = smov [#allocation6]   ;;  %s1673_s23 = scalar_lea.hbm %s2377_s2, 1024 }
  0x14   :  { %s35_s20 = sshll.u32 %s1726_s19, 4  ;;  %p1674_p8 = scmp.ne.s32.totalorder %s2377_s2, %s1673_s23  ;;  %s36_s20 = int_to_ptr.vmem [resolvable:$true] %s35_s20 }
  0x15   :  { %p1677_p9 = scmp.lt.u32.totalorder %s1673_s23, %s2377_s2 }
  0x17   :  { %p1679_p10 = pnand %p1677_p9, %p1674_p8 }
  0x19   :  { %1682 = shalt.err (!%p1679_p10)
}
  0x1a   :  { %s1683_s29 = scalar_lea.vmem %s36_s20, 1024  ;;  %p1688_p12 = scmp.lt.s32.totalorder %s36_s20, %s36_s20 }
  0x1b   :  { %p1684_p11 = scmp.ne.s32.totalorder %s36_s20, %s1683_s29  ;;  %p1689_p13 = scmp.lt.s32.totalorder %s1683_s29, %s1683_s29 }
  0x1d   :  { %p1690_p0 = por %p1689_p13, %p1688_p12 }
  0x1f   :  { %p1691_p1 = pnand %p1690_p0, %p1684_p11 }
  0x21   :  { %1694 = shalt.err (!%p1691_p1)
}
  0x22   :  { %41 = dma.hbm_to_vmem [thread:$0]  %s2377_s2, 1024, %s36_s20, [#allocation7], %s1724_s15, %s1724_s15, %s1725_s16  }
  0x23   :  { %1717 = dma.done.wait [#allocation4], 2048  }
  0x24   :  { %1718 = vsyncadd [#allocation4], 4294965248 }
  0x25   :  { %1719 = dma.done.wait [#allocation7], 1024  }
  0x26   :  { %1720 = vsyncadd [#allocation7], 4294966272  ;;  %v1727_v0 = vmov 1   ;;  %v1728_v1 = vmov 0   ;;  %v1819_v2 = vld [vmem:[%s2375_s0] sm:$0xff]  ;;  %v1826_v3 = vld [vmem:[%s2375_s0 + $0x8] sm:$0xff]  ;;  %v64_v20 = vlaneseq }
  0x27   :  { %1569 = vset.pattern.permute.xlu1 %v1727_v0  ;;  %1568 = vset.pattern.permute.xlu0 %v1728_v1  ;;  %v1729_v4 = vmov 3   ;;  %v1730_v5 = vmov 2   ;;  %v1834_v6 = vld [vmem:[%s2375_s0 + $0x10] sm:$0xff]  ;;  %v1842_v7 = vld [vmem:[%s2375_s0 + $0x18] sm:$0xff]  ;;  %v1731_v8 = vmov 4   ;;  %v1732_v9 = vmov 6  }
  0x28   :  { %112 = vperm.xlu1 %1569, %v1819_v2   ;;  %68 = vperm.xlu0 %1568, %v1819_v2   ;;  %v1733_v10 = vmov 5   ;;  %v1734_v11 = vmov 9   ;;  %v1735_v12 = vmov 7   ;;  %v1736_v13 = vmov 8   ;;  %v1617_v34 = vld [vmem:[#allocation3 + $0x40] sm:$0xff]   ;;  %v1619_v44 = vld [vmem:[#allocation3 + $0x48] sm:$0xff]  }
  0x29   :  { %v1737_v14 = vmov 12   ;;  %v1738_v15 = vmov 10   ;;  %v1739_v16 = vmov 11   ;;  %v1740_v17 = vmov 15   ;;  %1456 = vmatprep.subr.bf16.mxu0 %v1617_v34  ;;  %v1618_v41 = vld [vmem:[#allocation3] sm:$0xff]   ;;  %v1620_v45 = vld [vmem:[#allocation3 + $0x8] sm:$0xff]  }
  0x2a   :  { %v1741_v18 = vmov 13   ;;  %v1742_v19 = vmov 14   ;;  %v1898_v23 = vand.u32 127, %v64_v20  ;;  %v1743_v29 = vmov 0.0   ;;  %1457 = vmatpush3.bf16.msra.mxu0 %v1618_v41  ;;  %v1621_v54 = vld [vmem:[#allocation3 + $0x50] sm:$0xff]  }
  0x2b   :  { %1458 = vmatprep.subr.bf16.mxu0 %v1619_v44  ;;  %v1622_v57 = vld [vmem:[#allocation3 + $0x10] sm:$0xff]   ;;  %v1628_v44 = vld [vmem:[#allocation3 + $0x28] sm:$0xff]  }
  0x2c   :  { %115 = vperm.xlu1 %1569, %v1826_v3   ;;  %1572 = vset.pattern.permute.xlu0 %v1729_v4  ;;  %v1903_v26 = vadd.s32 128, %v1898_v23 }
  0x2d   :  { %203 = vperm.xlu0 %1572, %v1826_v3  }
  0x2e   :  { %1459 = vmatpush3.bf16.msra.mxu0 %v1620_v45  ;;  %v1629_v45 = vld [vmem:[#allocation3 + $0x70] sm:$0xff]  }
  0x2f   :  { %1460 = vmatprep.subr.bf16.mxu0 %v1621_v54  ;;  %v1632_v54 = vld [vmem:[#allocation3 + $0x38] sm:$0xff]  }
  0x30   :  { %1570 = vset.pattern.permute.xlu1 %v1730_v5 }
  0x31   :  { %159 = vperm.xlu1 %1570, %v1826_v3   ;;  %1573 = vset.pattern.permute.xlu0 %v1728_v1 }
  0x32   :  { %71 = vperm.xlu0 %1573, %v1826_v3   ;;  %1461 = vmatpush3.bf16.msra.mxu0 %v1622_v57 }
  0x35   :  { %1571 = vset.pattern.permute.xlu1 %v1729_v4 }
  0x36   :  { %200 = vperm.xlu1 %1571, %v1819_v2   ;;  %74 = vperm.xlu0 %1573, %v1834_v6  }
  0x3a   :  { %1574 = vset.pattern.permute.xlu1 %v1731_v8  ;;  %1577 = vset.pattern.permute.xlu0 %v1727_v0 }
  0x3b   :  { %244 = vperm.xlu1 %1574, %v1819_v2   ;;  %121 = vperm.xlu0 %1577, %v1842_v7  }
  0x3f   :  { %247 = vperm.xlu1 %1574, %v1826_v3   ;;  %1578 = vset.pattern.permute.xlu0 %v1730_v5 }
  0x40   :  { %156 = vperm.xlu0 %1578, %v1819_v2  }
  0x43   :  { %1575 = vset.pattern.permute.xlu1 %v1728_v1 }
  0x44   :  { %77 = vperm.xlu1 %1575, %v1842_v7   ;;  %162 = vperm.xlu0 %1578, %v1834_v6  }
  0x48   :  { %1576 = vset.pattern.permute.xlu1 %v1727_v0  ;;  %1582 = vset.pattern.permute.xlu0 %v1732_v9  ;;  %v1623_v0 = vld [vmem:[#allocation3 + $0x58] sm:$0xff]  }
  0x49   :  { %118 = vperm.xlu1 %1576, %v1834_v6   ;;  %335 = vperm.xlu0 %1582, %v1826_v3  }
  0x4a   :  { %1462 = vmatprep.subr.bf16.mxu0 %v1623_v0 }
  0x4d   :  { %1579 = vset.pattern.permute.xlu1 %v1733_v10  ;;  %1586 = vset.pattern.permute.xlu0 %v1731_v8 }
  0x4e   :  { %288 = vperm.xlu1 %1579, %v1819_v2   ;;  %253 = vperm.xlu0 %1586, %v1842_v7  }
  0x52   :  { %291 = vperm.xlu1 %1579, %v1826_v3   ;;  %1588 = vset.pattern.permute.xlu0 %v1733_v10 }
  0x53   :  { %294 = vperm.xlu0 %1588, %v1834_v6  }
  0x56   :  { %1580 = vset.pattern.permute.xlu1 %v1730_v5 }
  0x57   :  { %165 = vperm.xlu1 %1580, %v1842_v7   ;;  %1591 = vset.pattern.permute.xlu0 %v1734_v11 }
  0x58   :  { %467 = vperm.xlu0 %1591, %v1826_v3  }
  0x5b   :  { %1581 = vset.pattern.permute.xlu1 %v1732_v9 }
  0x5c   :  { %332 = vperm.xlu1 %1581, %v1819_v2   ;;  %1592 = vset.pattern.permute.xlu0 %v1735_v12 }
  0x5d   :  { %376 = vperm.xlu0 %1592, %v1819_v2  }
  0x60   :  { %1583 = vset.pattern.permute.xlu1 %v1729_v4 }
  0x61   :  { %206 = vperm.xlu1 %1583, %v1834_v6   ;;  %385 = vperm.xlu0 %1592, %v1842_v7  }
  0x65   :  { %209 = vperm.xlu1 %1583, %v1842_v7   ;;  %1597 = vset.pattern.permute.xlu0 %v1736_v13 }
  0x66   :  { %426 = vperm.xlu0 %1597, %v1834_v6  }
  0x69   :  { %1584 = vset.pattern.permute.xlu1 %v1735_v12 }
  0x6a   :  { %379 = vperm.xlu1 %1584, %v1826_v3   ;;  %1600 = vset.pattern.permute.xlu0 %v1737_v14 }
  0x6b   :  { %599 = vperm.xlu0 %1600, %v1826_v3  }
  0x6e   :  { %1585 = vset.pattern.permute.xlu1 %v1731_v8 }
  0x6f   :  { %250 = vperm.xlu1 %1585, %v1834_v6   ;;  %1601 = vset.pattern.permute.xlu0 %v1738_v15 }
  0x70   :  { %508 = vperm.xlu0 %1601, %v1819_v2  }
  0x73   :  { %1587 = vset.pattern.permute.xlu1 %v1736_v13 }
  0x74   :  { %420 = vperm.xlu1 %1587, %v1819_v2   ;;  %517 = vperm.xlu0 %1601, %v1842_v7  }
  0x78   :  { %423 = vperm.xlu1 %1587, %v1826_v3   ;;  %1606 = vset.pattern.permute.xlu0 %v1739_v16 }
  0x79   :  { %558 = vperm.xlu0 %1606, %v1834_v6  }
  0x7c   :  { %1589 = vset.pattern.permute.xlu1 %v1733_v10 }
  0x7d   :  { %297 = vperm.xlu1 %1589, %v1842_v7   ;;  %1609 = vset.pattern.permute.xlu0 %v1740_v17 }
  0x7e   :  { %731 = vperm.xlu0 %1609, %v1826_v3  }
  0x81   :  { %1590 = vset.pattern.permute.xlu1 %v1734_v11 }
  0x82   :  { %464 = vperm.xlu1 %1590, %v1819_v2   ;;  %1610 = vset.pattern.permute.xlu0 %v1741_v18 }
  0x83   :  { %640 = vperm.xlu0 %1610, %v1819_v2  }
  0x86   :  { %1593 = vset.pattern.permute.xlu1 %v1732_v9  ;;  %v1624_v9 = vld [vmem:[#allocation3 + $0x18] sm:$0xff]  }
  0x87   :  { %338 = vperm.xlu1 %1593, %v1834_v6   ;;  %646 = vperm.xlu0 %1610, %v1834_v6  }
  0x88   :  { %1463 = vmatpush3.bf16.msra.mxu0 %v1624_v9 }
  0x8b   :  { %341 = vperm.xlu1 %1593, %v1842_v7   ;;  %1614 = vset.pattern.permute.xlu0 %v1742_v19 }
  0x8c   :  { %693 = vperm.xlu0 %1614, %v1842_v7  }
  0x8f   :  { %1594 = vset.pattern.permute.xlu1 %v1738_v15 }
  0x90   :  { %511 = vperm.xlu1 %1594, %v1826_v3   ;;  %1616 = vset.pattern.permute.xlu0 %v1740_v17 }
  0x94   :  { %1595 = vset.pattern.permute.xlu1 %v1735_v12 }
  0x95   :  { %382 = vperm.xlu1 %1595, %v1834_v6  }
  0x99   :  { %1596 = vset.pattern.permute.xlu1 %v1739_v16 }
  0x9a   :  { %552 = vperm.xlu1 %1596, %v1819_v2  }
  0x9e   :  { %555 = vperm.xlu1 %1596, %v1826_v3  }
  0xa2   :  { %1598 = vset.pattern.permute.xlu1 %v1736_v13 }
  0xa3   :  { %429 = vperm.xlu1 %1598, %v1842_v7  }
  0xa7   :  { %1599 = vset.pattern.permute.xlu1 %v1737_v14  ;;  %v113_v21 = vpop.permute.xlu1 %112  ;;  %v69_v22 = vpop.permute.xlu0 %68 }
  0xa8   :  { %596 = vperm.xlu1 %1599, %v1819_v2   ;;  %vm123_vm6 = vcmp.eq.s32.totalorder %v113_v21, %v1898_v23  ;;  %vm124_vm7 = vcmp.eq.s32.totalorder %v113_v21, %v1903_v26  ;;  %vm79_vm8 = vcmp.eq.s32.totalorder %v69_v22, %v1898_v23  ;;  %vm80_vm9 = vcmp.eq.s32.totalorder %v69_v22, %v1903_v26 }
  0xa9   :  { %v1300_v46 = vsel %vm123_vm6, 1.0, %v1743_v29  ;;  %v1301_v47 = vsel %vm124_vm7, 1.0, %v1743_v29  ;;  %v1292_v48 = vsel %vm79_vm8, 1.0, %v1743_v29  ;;  %v1293_v49 = vsel %vm80_vm9, 1.0, %v1743_v29 }
  0xaa   :  { %v147_v55 = vadd.f32 %v1300_v46, %v1292_v48  ;;  %v148_v56 = vadd.f32 %v1301_v47, %v1293_v49  ;;  %v1630_v48 = vld [vmem:[#allocation3 + $0x30] sm:$0xff]  }
  0xab   :  { %v116_v24 = vpop.permute.xlu1 %115 }
  0xac   :  { %1602 = vset.pattern.permute.xlu1 %v1734_v11  ;;  %v204_v25 = vpop.permute.xlu0 %203  ;;  %vm125_vm0 = vcmp.eq.s32.totalorder %v116_v24, %v1898_v23  ;;  %vm126_vm1 = vcmp.eq.s32.totalorder %v116_v24, %v1903_v26 }
  0xad   :  { %470 = vperm.xlu1 %1602, %v1834_v6   ;;  %v1302_v30 = vsel %vm125_vm0, 1.0, %v1743_v29  ;;  %v1303_v31 = vsel %vm126_vm1, 1.0, %v1743_v29  ;;  %vm213_vm10 = vcmp.eq.s32.totalorder %v204_v25, %v1898_v23  ;;  %vm214_vm11 = vcmp.eq.s32.totalorder %v204_v25, %v1903_v26  ;;  %v1625_v25 = vld [vmem:[#allocation3 + $0x60] sm:$0xff]  }
  0xae   :  { %v1318_v52 = vsel %vm213_vm10, 1.0, %v1743_v29  ;;  %v1319_v53 = vsel %vm214_vm11, 1.0, %v1743_v29  ;;  %1464 = vmatprep.subr.bf16.mxu0 %v1625_v25 }
  0xb0   :  { %v160_v27 = vpop.permute.xlu1 %159 }
  0xb1   :  { %473 = vperm.xlu1 %1602, %v1842_v7   ;;  %v72_v28 = vpop.permute.xlu0 %71  ;;  %vm169_vm2 = vcmp.eq.s32.totalorder %v160_v27, %v1898_v23  ;;  %vm170_vm3 = vcmp.eq.s32.totalorder %v160_v27, %v1903_v26 }
  0xb2   :  { %vm81_vm4 = vcmp.eq.s32.totalorder %v72_v28, %v1898_v23  ;;  %vm82_vm5 = vcmp.eq.s32.totalorder %v72_v28, %v1903_v26  ;;  %v1310_v37 = vsel %vm169_vm2, 1.0, %v1743_v29  ;;  %v1311_v38 = vsel %vm170_vm3, 1.0, %v1743_v29 }
  0xb3   :  { %v1294_v32 = vsel %vm81_vm4, 1.0, %v1743_v29  ;;  %v1295_v33 = vsel %vm82_vm5, 1.0, %v1743_v29 }
  0xb4   :  { %v149_v35 = vadd.f32 %v1302_v30, %v1294_v32  ;;  %v150_v36 = vadd.f32 %v1303_v31, %v1295_v33  ;;  %v1626_v33 = vld [vmem:[#allocation3 + $0x20] sm:$0xff]  }
  0xb5   :  { %1603 = vset.pattern.permute.xlu1 %v1741_v18  ;;  %v201_v39 = vpop.permute.xlu1 %200  ;;  %v1919_v40 = vpop.permute.xlu0 %74  ;;  %1465 = vmatpush3.bf16.msra.mxu0 %v1626_v33 }
  0xb6   :  { %v193_v42 = vadd.f32 %v1310_v37, %v149_v35  ;;  %v194_v43 = vadd.f32 %v1311_v38, %v150_v36  ;;  %643 = vperm.xlu1 %1603, %v1826_v3   ;;  %vm211_vm12 = vcmp.eq.s32.totalorder %v201_v39, %v1898_v23  ;;  %vm212_vm13 = vcmp.eq.s32.totalorder %v201_v39, %v1903_v26  ;;  %v1627_v39 = vld [vmem:[#allocation3 + $0x68] sm:$0xff]  }
  0xb7   :  { %v1316_v10 = vsel %vm211_vm12, 1.0, %v1743_v29  ;;  %v1317_v11 = vsel %vm212_vm13, 1.0, %v1743_v29  ;;  %vm83_vm8 = vcmp.eq.s32.totalorder %v1919_v40, %v1898_v23  ;;  %vm84_vm9 = vcmp.eq.s32.totalorder %v1919_v40, %v1903_v26  ;;  %1466 = vmatprep.subr.bf16.mxu0 %v1627_v39 }
  0xb8   :  { %v237_v59 = vadd.f32 %v1318_v52, %v193_v42  ;;  %v238_v60 = vadd.f32 %v1319_v53, %v194_v43  ;;  %v1296_v36 = vsel %vm83_vm8, 1.0, %v1743_v29  ;;  %v1297_v37 = vsel %vm84_vm9, 1.0, %v1743_v29 }
  0xb9   :  { %1467 = vmatpush3.bf16.msra.mxu0 %v1628_v44 }
  0xba   :  { %1604 = vset.pattern.permute.xlu1 %v1738_v15  ;;  %v245_v50 = vpop.permute.xlu1 %244  ;;  %v122_v51 = vpop.permute.xlu0 %121  ;;  %1468 = vmatprep.subr.bf16.mxu0 %v1629_v45 }
  0xbb   :  { %514 = vperm.xlu1 %1604, %v1834_v6   ;;  %vm129_vm14 = vcmp.eq.s32.totalorder %v122_v51, %v1898_v23  ;;  %vm130_vm15 = vcmp.eq.s32.totalorder %v122_v51, %v1903_v26  ;;  %vm255_vm4 = vcmp.eq.s32.totalorder %v245_v50, %v1898_v23  ;;  %vm256_vm5 = vcmp.eq.s32.totalorder %v245_v50, %v1903_v26  ;;  %v1631_v51 = vld [vmem:[#allocation3 + $0x78] sm:$0xff]  }
  0xbc   :  { %v1306_v15 = vsel %vm129_vm14, 1.0, %v1743_v29  ;;  %v1307_v20 = vsel %vm130_vm15, 1.0, %v1743_v29  ;;  %v1324_v30 = vsel %vm255_vm4, 1.0, %v1743_v29 }
  0xbd   :  { %1469 = vmatpush3.bf16.msra.mxu0 %v1630_v48 }
  0xbe   :  { %v248_v58 = vpop.permute.xlu1 %247  ;;  %1470 = vmatprep.subr.bf16.mxu0 %v1631_v51 }
  0xbf   :  { %vm257_vm0 = vcmp.eq.s32.totalorder %v248_v58, %v1898_v23  ;;  %vm258_vm1 = vcmp.eq.s32.totalorder %v248_v58, %v1903_v26  ;;  %1605 = vset.pattern.permute.xlu1 %v1742_v19  ;;  %v157_v61 = vpop.permute.xlu0 %156 }
  0xc0   :  { %v1326_v62 = vsel %vm257_vm0, 1.0, %v1743_v29  ;;  %v1327_v63 = vsel %vm258_vm1, 1.0, %v1743_v29  ;;  %vm167_vm2 = vcmp.eq.s32.totalorder %v157_v61, %v1898_v23  ;;  %vm168_vm3 = vcmp.eq.s32.totalorder %v157_v61, %v1903_v26  ;;  %684 = vperm.xlu1 %1605, %v1819_v2  }
  0xc1   :  { %v1948_v1 = vadd.f32 %v1326_v62, %v237_v59  ;;  %v1950_v4 = vadd.f32 %v1327_v63, %v238_v60  ;;  %v1308_v5 = vsel %vm167_vm2, 1.0, %v1743_v29  ;;  %v1309_v8 = vsel %vm168_vm3, 1.0, %v1743_v29  ;;  %1471 = vmatpush3.bf16.msra.mxu0 %v1632_v54 }
  0xc2   :  { %v191_v12 = vadd.f32 %v1308_v5, %v147_v55  ;;  %v192_v13 = vadd.f32 %v1309_v8, %v148_v56 }
  0xc3   :  { %v78_v21 = vpop.permute.xlu1 %77 }
  0xc4   :  { %v235_v22 = vadd.f32 %v1316_v10, %v191_v12  ;;  %v236_v24 = vadd.f32 %v1317_v11, %v192_v13  ;;  %vm85_vm6 = vcmp.eq.s32.totalorder %v78_v21, %v1898_v23  ;;  %vm86_vm7 = vcmp.eq.s32.totalorder %v78_v21, %v1903_v26  ;;  %687 = vperm.xlu1 %1605, %v1826_v3  }
  0xc5   :  { %v1298_v27 = vsel %vm85_vm6, 1.0, %v1743_v29  ;;  %v1299_v28 = vsel %vm86_vm7, 1.0, %v1743_v29  ;;  %v1325_v3 = vsel %vm256_vm5, 1.0, %v1743_v29 }
  0xc6   :  { %v153_v31 = vadd.f32 %v1306_v15, %v1298_v27  ;;  %v154_v32 = vadd.f32 %v1307_v20, %v1299_v28  ;;  %v279_v34 = vadd.f32 %v1324_v30, %v235_v22  ;;  %v280_v35 = vadd.f32 %v1325_v3, %v236_v24 }
  0xc8   :  { %1607 = vset.pattern.permute.xlu1 %v1739_v16  ;;  %v119_v38 = vpop.permute.xlu1 %118 }
  0xc9   :  { %vm127_vm10 = vcmp.eq.s32.totalorder %v119_v38, %v1898_v23  ;;  %vm128_vm11 = vcmp.eq.s32.totalorder %v119_v38, %v1903_v26  ;;  %561 = vperm.xlu1 %1607, %v1842_v7  }
  0xca   :  { %v1304_v40 = vsel %vm127_vm10, 1.0, %v1743_v29  ;;  %v1305_v41 = vsel %vm128_vm11, 1.0, %v1743_v29 }
  0xcb   :  { %v151_v42 = vadd.f32 %v1304_v40, %v1296_v36  ;;  %v152_v43 = vadd.f32 %v1305_v41, %v1297_v37 }
  0xcd   :  { %1608 = vset.pattern.permute.xlu1 %v1740_v17  ;;  %v289_v16 = vpop.permute.xlu1 %288 }
  0xce   :  { %vm299_vm12 = vcmp.eq.s32.totalorder %v289_v16, %v1898_v23  ;;  %vm300_vm13 = vcmp.eq.s32.totalorder %v289_v16, %v1903_v26  ;;  %728 = vperm.xlu1 %1608, %v1819_v2  }
  0xcf   :  { %v1332_v46 = vsel %vm299_vm12, 1.0, %v1743_v29  ;;  %v1333_v47 = vsel %vm300_vm13, 1.0, %v1743_v29 }
  0xd0   :  { %v323_v49 = vadd.f32 %v1332_v46, %v279_v34  ;;  %v324_v50 = vadd.f32 %v1333_v47, %v280_v35 }
  0xd1   :  { %v292_v52 = vpop.permute.xlu1 %291 }
  0xd2   :  { %vm301_vm14 = vcmp.eq.s32.totalorder %v292_v52, %v1898_v23  ;;  %vm302_vm15 = vcmp.eq.s32.totalorder %v292_v52, %v1903_v26  ;;  %1611 = vset.pattern.permute.xlu1 %v1737_v14  ;;  %v163_v14 = vpop.permute.xlu0 %162 }
  0xd3   :  { %v1334_v53 = vsel %vm301_vm14, 1.0, %v1743_v29  ;;  %v1335_v2 = vsel %vm302_vm15, 1.0, %v1743_v29  ;;  %602 = vperm.xlu1 %1611, %v1834_v6   ;;  %vm171_vm2 = vcmp.eq.s32.totalorder %v163_v14, %v1898_v23  ;;  %vm172_vm3 = vcmp.eq.s32.totalorder %v163_v14, %v1903_v26 }
  0xd4   :  { %v325_v55 = vadd.f32 %v1334_v53, %v1948_v1  ;;  %v326_v56 = vadd.f32 %v1335_v2, %v1950_v4  ;;  %v1312_v1 = vsel %vm171_vm2, 1.0, %v1743_v29  ;;  %v1313_v4 = vsel %vm172_vm3, 1.0, %v1743_v29 }
  0xd5   :  { %v195_v9 = vadd.f32 %v1312_v1, %v151_v42  ;;  %v196_v10 = vadd.f32 %v1313_v4, %v152_v43 }
  0xd6   :  { %v166_v57 = vpop.permute.xlu1 %165  ;;  %v336_v13 = vpop.permute.xlu0 %335 }
  0xd7   :  { %vm173_vm0 = vcmp.eq.s32.totalorder %v166_v57, %v1898_v23  ;;  %vm174_vm1 = vcmp.eq.s32.totalorder %v166_v57, %v1903_v26  ;;  %605 = vperm.xlu1 %1611, %v1842_v7   ;;  %vm345_vm8 = vcmp.eq.s32.totalorder %v336_v13, %v1898_v23  ;;  %vm346_vm9 = vcmp.eq.s32.totalorder %v336_v13, %v1903_v26 }
  0xd8   :  { %v1314_v58 = vsel %vm173_vm0, 1.0, %v1743_v29  ;;  %v1315_v59 = vsel %vm174_vm1, 1.0, %v1743_v29  ;;  %v1342_v24 = vsel %vm345_vm8, 1.0, %v1743_v29  ;;  %v1343_v25 = vsel %vm346_vm9, 1.0, %v1743_v29 }
  0xd9   :  { %v197_v60 = vadd.f32 %v1314_v58, %v153_v31  ;;  %v198_v61 = vadd.f32 %v1315_v59, %v154_v32  ;;  %v369_v3 = vadd.f32 %v1342_v24, %v325_v55  ;;  %v370_v31 = vadd.f32 %v1343_v25, %v326_v56 }
  0xda   :  { %v254_v39 = vpop.permute.xlu0 %253 }
  0xdb   :  { %1612 = vset.pattern.permute.xlu1 %v1741_v18  ;;  %v333_v62 = vpop.permute.xlu1 %332  ;;  %vm261_vm0 = vcmp.eq.s32.totalorder %v254_v39, %v1898_v23  ;;  %vm262_vm1 = vcmp.eq.s32.totalorder %v254_v39, %v1903_v26 }
  0xdc   :  { %vm343_vm4 = vcmp.eq.s32.totalorder %v333_v62, %v1898_v23  ;;  %vm344_vm5 = vcmp.eq.s32.totalorder %v333_v62, %v1903_v26  ;;  %649 = vperm.xlu1 %1612, %v1842_v7   ;;  %v1330_v41 = vsel %vm261_vm0, 1.0, %v1743_v29  ;;  %v1331_v42 = vsel %vm262_vm1, 1.0, %v1743_v29 }
  0xdd   :  { %v1340_v63 = vsel %vm343_vm4, 1.0, %v1743_v29  ;;  %v1341_v0 = vsel %vm344_vm5, 1.0, %v1743_v29 }
  0xde   :  { %v2020_v5 = vadd.f32 %v1340_v63, %v323_v49  ;;  %v2022_v8 = vadd.f32 %v1341_v0, %v324_v50  ;;  %v295_v49 = vpop.permute.xlu0 %294 }
  0xdf   :  { %vm303_vm4 = vcmp.eq.s32.totalorder %v295_v49, %v1898_v23  ;;  %vm304_vm5 = vcmp.eq.s32.totalorder %v295_v49, %v1903_v26 }
  0xe0   :  { %1613 = vset.pattern.permute.xlu1 %v1742_v19  ;;  %v207_v18 = vpop.permute.xlu1 %206  ;;  %v1336_v51 = vsel %vm303_vm4, 1.0, %v1743_v29  ;;  %v1337_v52 = vsel %vm304_vm5, 1.0, %v1743_v29 }
  0xe1   :  { %vm215_vm6 = vcmp.eq.s32.totalorder %v207_v18, %v1898_v23  ;;  %vm216_vm7 = vcmp.eq.s32.totalorder %v207_v18, %v1903_v26  ;;  %690 = vperm.xlu1 %1613, %v1834_v6  }
  0xe2   :  { %v1320_v11 = vsel %vm215_vm6, 1.0, %v1743_v29  ;;  %v1321_v12 = vsel %vm216_vm7, 1.0, %v1743_v29  ;;  %v468_v0 = vpop.permute.xlu0 %467 }
  0xe3   :  { %v239_v15 = vadd.f32 %v1320_v11, %v195_v9  ;;  %v240_v20 = vadd.f32 %v1321_v12, %v196_v10 }
  0xe4   :  { %v210_v19 = vpop.permute.xlu1 %209 }
  0xe5   :  { %vm217_vm10 = vcmp.eq.s32.totalorder %v210_v19, %v1898_v23  ;;  %vm218_vm11 = vcmp.eq.s32.totalorder %v210_v19, %v1903_v26  ;;  %1615 = vset.pattern.permute.xlu1 %v1740_v17 }
  0xe6   :  { %v1322_v21 = vsel %vm217_vm10, 1.0, %v1743_v29  ;;  %v1323_v22 = vsel %vm218_vm11, 1.0, %v1743_v29  ;;  %734 = vperm.xlu1 %1615, %v1834_v6   ;;  %v377_v4 = vpop.permute.xlu0 %376 }
  0xe7   :  { %v241_v27 = vadd.f32 %v1322_v21, %v197_v60  ;;  %v242_v28 = vadd.f32 %v1323_v22, %v198_v61  ;;  %vm387_vm10 = vcmp.eq.s32.totalorder %v377_v4, %v1898_v23  ;;  %vm388_vm11 = vcmp.eq.s32.totalorder %v377_v4, %v1903_v26 }
  0xe9   :  { %v380_v30 = vpop.permute.xlu1 %379  ;;  %v285_v44 = vadd.f32 %v1330_v41, %v241_v27  ;;  %v286_v45 = vadd.f32 %v1331_v42, %v242_v28  ;;  %v1348_v27 = vsel %vm387_vm10, 1.0, %v1743_v29  ;;  %v1349_v28 = vsel %vm388_vm11, 1.0, %v1743_v29 }
  0xea   :  { %vm389_vm12 = vcmp.eq.s32.totalorder %v380_v30, %v1898_v23  ;;  %vm390_vm13 = vcmp.eq.s32.totalorder %v380_v30, %v1903_v26  ;;  %737 = vperm.xlu1 %1615, %v1842_v7   ;;  %v2091_v9 = vpop.permute.xlu0 %385 }
  0xeb   :  { %v1350_v17 = vsel %vm389_vm12, 1.0, %v1743_v29  ;;  %v1351_v32 = vsel %vm390_vm13, 1.0, %v1743_v29 }
  0xec   :  { %v2045_v6 = vadd.f32 %v1350_v17, %v369_v3  ;;  %v2047_v33 = vadd.f32 %v1351_v32, %v370_v31  ;;  %v411_v32 = vadd.f32 %v1348_v27, %v2020_v5 }
  0xee   :  { %v251_v34 = vpop.permute.xlu1 %250  ;;  %v2093_v11 = vpop.permute.xlu0 %426 }
  0xef   :  { %vm259_vm14 = vcmp.eq.s32.totalorder %v251_v34, %v1898_v23  ;;  %vm260_vm15 = vcmp.eq.s32.totalorder %v251_v34, %v1903_v26  ;;  %v412_v34 = vadd.f32 %v1349_v28, %v2022_v8 }
  0xf0   :  { %v1328_v35 = vsel %vm259_vm14, 1.0, %v1743_v29  ;;  %v1329_v36 = vsel %vm260_vm15, 1.0, %v1743_v29  ;;  %vm477_vm14 = vcmp.eq.s32.totalorder %v468_v0, %v1898_v23  ;;  %vm478_vm15 = vcmp.eq.s32.totalorder %v468_v0, %v1903_v26 }
  0xf1   :  { %v283_v37 = vadd.f32 %v1328_v35, %v239_v15  ;;  %v284_v38 = vadd.f32 %v1329_v36, %v240_v20  ;;  %v1366_v31 = vsel %vm477_vm14, 1.0, %v1743_v29  ;;  %v1367_v17 = vsel %vm478_vm15, 1.0, %v1743_v29 }
  0xf2   :  { %v600_v13 = vpop.permute.xlu0 %599 }
  0xf3   :  { %v2053_v7 = vpop.permute.xlu1 %420  ;;  %v327_v2 = vadd.f32 %v1336_v51, %v283_v37  ;;  %v328_v54 = vadd.f32 %v1337_v52, %v284_v38 }
  0xf4   :  { %vm431_vm0 = vcmp.eq.s32.totalorder %v2053_v7, %v1898_v23  ;;  %vm432_vm1 = vcmp.eq.s32.totalorder %v2053_v7, %v1903_v26 }
  0xf5   :  { %v1356_v35 = vsel %vm431_vm0, 1.0, %v1743_v29  ;;  %v1357_v36 = vsel %vm432_vm1, 1.0, %v1743_v29 }
  0xf6   :  { %v509_v20 = vpop.permute.xlu0 %508  ;;  %v456_v41 = vadd.f32 %v1357_v36, %v412_v34 }
  0xf7   :  { %v2057_v40 = vpop.permute.xlu1 %423  ;;  %vm519_vm10 = vcmp.eq.s32.totalorder %v509_v20, %v1898_v23  ;;  %vm520_vm11 = vcmp.eq.s32.totalorder %v509_v20, %v1903_v26 }
  0xf8   :  { %vm433_vm12 = vcmp.eq.s32.totalorder %v2057_v40, %v1898_v23  ;;  %vm434_vm13 = vcmp.eq.s32.totalorder %v2057_v40, %v1903_v26  ;;  %v455_v40 = vadd.f32 %v1356_v35, %v411_v32  ;;  %v1373_v49 = vsel %vm520_vm11, 1.0, %v1743_v29 }
  0xf9   :  { %v1358_v30 = vsel %vm433_vm12, 1.0, %v1743_v29  ;;  %v1359_v3 = vsel %vm434_vm13, 1.0, %v1743_v29  ;;  %vm394_vm11 = vcmp.eq.s32.totalorder %v2091_v9, %v1903_v26 }
  0xfa   :  { %v2101_v21 = vpop.permute.xlu0 %517  ;;  %v457_v38 = vadd.f32 %v1358_v30, %v2045_v6  ;;  %v458_v7 = vadd.f32 %v1359_v3, %v2047_v33 }
  0xfc   :  { %v298_v43 = vpop.permute.xlu1 %297 }
  0xfd   :  { %vm305_vm2 = vcmp.eq.s32.totalorder %v298_v43, %v1898_v23  ;;  %vm306_vm3 = vcmp.eq.s32.totalorder %v298_v43, %v1903_v26 }
  0xfe   :  { %v1338_v16 = vsel %vm305_vm2, 1.0, %v1743_v29  ;;  %v1339_v46 = vsel %vm306_vm3, 1.0, %v1743_v29  ;;  %v2115_v25 = vpop.permute.xlu0 %558 }
  0xff   :  { %v329_v47 = vadd.f32 %v1338_v16, %v285_v44  ;;  %v330_v48 = vadd.f32 %v1339_v46, %v286_v45  ;;  %v501_v44 = vadd.f32 %v1366_v31, %v457_v38  ;;  %v502_v45 = vadd.f32 %v1367_v17, %v458_v7 }
 0x101   :  { %v2067_v50 = vpop.permute.xlu1 %464 }
 0x102   :  { %vm475_vm2 = vcmp.eq.s32.totalorder %v2067_v50, %v1898_v23  ;;  %vm476_vm3 = vcmp.eq.s32.totalorder %v2067_v50, %v1903_v26  ;;  %v2145_v39 = vpop.permute.xlu0 %731 }
 0x103   :  { %v1364_v5 = vsel %vm475_vm2, 1.0, %v1743_v29  ;;  %v1365_v8 = vsel %vm476_vm3, 1.0, %v1743_v29 }
 0x104   :  { %v499_v42 = vadd.f32 %v1364_v5, %v455_v40  ;;  %v500_v43 = vadd.f32 %v1365_v8, %v456_v41 }
 0x106   :  { %v339_v53 = vpop.permute.xlu1 %338 }
 0x107   :  { %vm347_vm6 = vcmp.eq.s32.totalorder %v339_v53, %v1898_v23  ;;  %vm348_vm7 = vcmp.eq.s32.totalorder %v339_v53, %v1903_v26 }
 0x108   :  { %v1344_v55 = vsel %vm347_vm6, 1.0, %v1743_v29  ;;  %v1345_v56 = vsel %vm348_vm7, 1.0, %v1743_v29  ;;  %vm609_vm6 = vcmp.eq.s32.totalorder %v600_v13, %v1898_v23  ;;  %vm610_vm7 = vcmp.eq.s32.totalorder %v600_v13, %v1903_v26 }
 0x109   :  { %v2075_v57 = vadd.f32 %v1344_v55, %v327_v2  ;;  %v2077_v14 = vadd.f32 %v1345_v56, %v328_v54  ;;  %v1390_v52 = vsel %vm609_vm6, 1.0, %v1743_v29  ;;  %v1391_v53 = vsel %vm610_vm7, 1.0, %v1743_v29  ;;  %v641_v2 = vpop.permute.xlu0 %640 }
 0x10a   :  { %v342_v58 = vpop.permute.xlu1 %341  ;;  %vm651_vm2 = vcmp.eq.s32.totalorder %v641_v2, %v1898_v23  ;;  %vm652_vm3 = vcmp.eq.s32.totalorder %v641_v2, %v1903_v26 }
 0x10b   :  { %vm349_vm8 = vcmp.eq.s32.totalorder %v342_v58, %v1898_v23  ;;  %vm350_vm9 = vcmp.eq.s32.totalorder %v342_v58, %v1903_v26  ;;  %v1396_v3 = vsel %vm651_vm2, 1.0, %v1743_v29  ;;  %v1397_v31 = vsel %vm652_vm3, 1.0, %v1743_v29 }
 0x10c   :  { %v1346_v59 = vsel %vm349_vm8, 1.0, %v1743_v29  ;;  %v1347_v60 = vsel %vm350_vm9, 1.0, %v1743_v29 }
 0x10d   :  { %v2083_v61 = vadd.f32 %v1346_v59, %v329_v47  ;;  %v2085_v62 = vadd.f32 %v1347_v60, %v330_v48  ;;  %v1372_v48 = vsel %vm519_vm10, 1.0, %v1743_v29  ;;  %vm393_vm10 = vcmp.eq.s32.totalorder %v2091_v9, %v1898_v23 }
 0x10e   :  { %v543_v60 = vadd.f32 %v1372_v48, %v499_v42 }
 0x10f   :  { %v512_v63 = vpop.permute.xlu1 %511 }
 0x110   :  { %vm521_vm4 = vcmp.eq.s32.totalorder %v512_v63, %v1898_v23  ;;  %vm522_vm5 = vcmp.eq.s32.totalorder %v512_v63, %v1903_v26  ;;  %v544_v63 = vadd.f32 %v1373_v49, %v500_v43 }
 0x111   :  { %v1374_v6 = vsel %vm521_vm4, 1.0, %v1743_v29  ;;  %v1375_v33 = vsel %vm522_vm5, 1.0, %v1743_v29 }
 0x112   :  { %v545_v50 = vadd.f32 %v1374_v6, %v501_v44  ;;  %v546_v51 = vadd.f32 %v1375_v33, %v502_v45 }
 0x114   :  { %v2087_v1 = vpop.permute.xlu1 %382 }
 0x119   :  { %v2089_v18 = vpop.permute.xlu1 %552 }
 0x11a   :  { %vm563_vm12 = vcmp.eq.s32.totalorder %v2089_v18, %v1898_v23  ;;  %vm564_vm13 = vcmp.eq.s32.totalorder %v2089_v18, %v1903_v26 }
 0x11b   :  { %v1380_v54 = vsel %vm563_vm12, 1.0, %v1743_v29  ;;  %v1381_v55 = vsel %vm564_vm13, 1.0, %v1743_v29  ;;  %vm391_vm12 = vcmp.eq.s32.totalorder %v2087_v1, %v1898_v23  ;;  %vm392_vm13 = vcmp.eq.s32.totalorder %v2087_v1, %v1903_v26 }
 0x11c   :  { %v587_v18 = vadd.f32 %v1380_v54, %v543_v60  ;;  %v1352_v48 = vsel %vm391_vm12, 1.0, %v1743_v29  ;;  %v1353_v49 = vsel %vm392_vm13, 1.0, %v1743_v29  ;;  %vm567_vm12 = vcmp.eq.s32.totalorder %v2115_v25, %v1898_v23 }
 0x11d   :  { %v556_v10 = vpop.permute.xlu1 %555  ;;  %v415_v1 = vadd.f32 %v1352_v48, %v2075_v57  ;;  %vm568_vm13 = vcmp.eq.s32.totalorder %v2115_v25, %v1903_v26 }
 0x11e   :  { %vm565_vm8 = vcmp.eq.s32.totalorder %v556_v10, %v1898_v23  ;;  %vm566_vm9 = vcmp.eq.s32.totalorder %v556_v10, %v1903_v26  ;;  %v588_v10 = vadd.f32 %v1381_v55, %v544_v63  ;;  %v416_v55 = vadd.f32 %v1353_v49, %v2077_v14 }
 0x11f   :  { %v1382_v46 = vsel %vm565_vm8, 1.0, %v1743_v29  ;;  %v1383_v47 = vsel %vm566_vm9, 1.0, %v1743_v29  ;;  %vm741_vm8 = vcmp.eq.s32.totalorder %v2145_v39, %v1898_v23  ;;  %vm742_vm9 = vcmp.eq.s32.totalorder %v2145_v39, %v1903_v26 }
 0x120   :  { %v589_v56 = vadd.f32 %v1382_v46, %v545_v50  ;;  %v590_v58 = vadd.f32 %v1383_v47, %v546_v51  ;;  %v1414_v39 = vsel %vm741_vm8, 1.0, %v1743_v29  ;;  %v1415_v41 = vsel %vm742_vm9, 1.0, %v1743_v29 }
 0x121   :  { %v1355_v50 = vsel %vm394_vm11, 1.0, %v1743_v29 }
 0x122   :  { %v2095_v12 = vpop.permute.xlu1 %429  ;;  %v633_v13 = vadd.f32 %v1390_v52, %v589_v56  ;;  %v418_v14 = vadd.f32 %v1355_v50, %v2085_v62 }
 0x123   :  { %vm437_vm2 = vcmp.eq.s32.totalorder %v2095_v12, %v1898_v23  ;;  %vm438_vm3 = vcmp.eq.s32.totalorder %v2095_v12, %v1903_v26 }
 0x124   :  { %v1362_v9 = vsel %vm437_vm2, 1.0, %v1743_v29  ;;  %v1363_v12 = vsel %vm438_vm3, 1.0, %v1743_v29 }
 0x125   :  { %v462_v63 = vadd.f32 %v1363_v12, %v418_v14 }
 0x127   :  { %v2097_v15 = vpop.permute.xlu1 %596 }
 0x128   :  { %vm607_vm14 = vcmp.eq.s32.totalorder %v2097_v15, %v1898_v23  ;;  %vm608_vm15 = vcmp.eq.s32.totalorder %v2097_v15, %v1903_v26  ;;  %v634_v15 = vadd.f32 %v1391_v53, %v590_v58 }
 0x129   :  { %v1388_v0 = vsel %vm607_vm14, 1.0, %v1743_v29  ;;  %v1389_v4 = vsel %vm608_vm15, 1.0, %v1743_v29 }
 0x12a   :  { %v631_v27 = vadd.f32 %v1388_v0, %v587_v18  ;;  %v632_v28 = vadd.f32 %v1389_v4, %v588_v10 }
 0x12c   :  { %v2099_v19 = vpop.permute.xlu1 %470  ;;  %v675_v7 = vadd.f32 %v1396_v3, %v631_v27  ;;  %v676_v5 = vadd.f32 %v1397_v31, %v632_v28  ;;  %v1385_v27 = vsel %vm568_vm13, 1.0, %v1743_v29  ;;  %v647_v28 = vpop.permute.xlu0 %646 }
 0x130   :  { %v2103_v22 = vpop.permute.xlu1 %473 }
 0x131   :  { %vm481_vm8 = vcmp.eq.s32.totalorder %v2103_v22, %v1898_v23  ;;  %vm482_vm9 = vcmp.eq.s32.totalorder %v2103_v22, %v1903_v26 }
 0x132   :  { %v1371_v62 = vsel %vm482_vm9, 1.0, %v1743_v29 }
 0x135   :  { %v2111_v24 = vpop.permute.xlu1 %643 }
 0x136   :  { %vm653_vm0 = vcmp.eq.s32.totalorder %v2111_v24, %v1898_v23  ;;  %vm654_vm1 = vcmp.eq.s32.totalorder %v2111_v24, %v1903_v26 }
 0x137   :  { %v1398_v20 = vsel %vm653_vm0, 1.0, %v1743_v29  ;;  %v1399_v24 = vsel %vm654_vm1, 1.0, %v1743_v29  ;;  %vm435_vm0 = vcmp.eq.s32.totalorder %v2093_v11, %v1898_v23  ;;  %vm436_vm1 = vcmp.eq.s32.totalorder %v2093_v11, %v1903_v26 }
 0x138   :  { %v677_v34 = vadd.f32 %v1398_v20, %v633_v13  ;;  %v678_v35 = vadd.f32 %v1399_v24, %v634_v15  ;;  %v1354_v11 = vsel %vm393_vm10, 1.0, %v1743_v29  ;;  %v1360_v2 = vsel %vm435_vm0, 1.0, %v1743_v29 }
 0x139   :  { %v1361_v54 = vsel %vm436_vm1, 1.0, %v1743_v29  ;;  %v417_v57 = vadd.f32 %v1354_v11, %v2083_v61  ;;  %v459_v22 = vadd.f32 %v1360_v2, %v415_v1  ;;  %v1370_v61 = vsel %vm481_vm8, 1.0, %v1743_v29 }
 0x13a   :  { %v2135_v37 = vpop.permute.xlu1 %514  ;;  %v506_v13 = vadd.f32 %v1371_v62, %v462_v63  ;;  %v1384_v24 = vsel %vm567_vm12, 1.0, %v1743_v29  ;;  %v1633_v63 = vld [vmem:[#allocation6] sm:$0xff]  }
 0x13b   :  { %vm523_vm10 = vcmp.eq.s32.totalorder %v2135_v37, %v1898_v23  ;;  %vm524_vm11 = vcmp.eq.s32.totalorder %v2135_v37, %v1903_v26  ;;  %v461_v60 = vadd.f32 %v1362_v9, %v417_v57  ;;  %1504 = vmatprep.subr.bf16.mxu1 %v1633_v63 }
 0x13c   :  { %v1376_v18 = vsel %vm523_vm10, 1.0, %v1743_v29  ;;  %v1377_v37 = vsel %vm524_vm11, 1.0, %v1743_v29  ;;  %1505 = vmatpush3.bf16.msra.mxu1 %v1633_v63 }
 0x13d   :  { %v505_v10 = vadd.f32 %v1370_v61, %v461_v60 }
 0x13f   :  { %v685_v16 = vpop.permute.xlu1 %684 }
 0x140   :  { %vm695_vm6 = vcmp.eq.s32.totalorder %v685_v16, %v1898_v23  ;;  %vm696_vm7 = vcmp.eq.s32.totalorder %v685_v16, %v1903_v26 }
 0x141   :  { %v1404_v36 = vsel %vm695_vm6, 1.0, %v1743_v29  ;;  %v1405_v38 = vsel %vm696_vm7, 1.0, %v1743_v29  ;;  %vm525_vm6 = vcmp.eq.s32.totalorder %v2101_v21, %v1898_v23  ;;  %vm526_vm7 = vcmp.eq.s32.totalorder %v2101_v21, %v1903_v26 }
 0x142   :  { %v719_v33 = vadd.f32 %v1404_v36, %v675_v7  ;;  %v720_v42 = vadd.f32 %v1405_v38, %v676_v5  ;;  %v1378_v25 = vsel %vm525_vm6, 1.0, %v1743_v29  ;;  %v1379_v20 = vsel %vm526_vm7, 1.0, %v1743_v29  ;;  %v694_v36 = vpop.permute.xlu0 %693 }
 0x143   :  { %v688_v59 = vpop.permute.xlu1 %687  ;;  %v549_v21 = vadd.f32 %v1378_v25, %v505_v10  ;;  %vm655_vm6 = vcmp.eq.s32.totalorder %v647_v28, %v1898_v23  ;;  %vm656_vm7 = vcmp.eq.s32.totalorder %v647_v28, %v1903_v26  ;;  %vm701_vm8 = vcmp.eq.s32.totalorder %v694_v36, %v1898_v23 }
 0x144   :  { %vm697_vm4 = vcmp.eq.s32.totalorder %v688_v59, %v1898_v23  ;;  %vm698_vm5 = vcmp.eq.s32.totalorder %v688_v59, %v1903_v26  ;;  %v460_v59 = vadd.f32 %v1361_v54, %v416_v55  ;;  %vm702_vm9 = vcmp.eq.s32.totalorder %v694_v36, %v1903_v26  ;;  %v1643_v36 = vld [vmem:[%s2381_s6 + $0x10] sm:$0xff]  }
 0x145   :  { %v1406_v17 = vsel %vm697_vm4, 1.0, %v1743_v29  ;;  %v1407_v32 = vsel %vm698_vm5, 1.0, %v1743_v29  ;;  %vm479_vm4 = vcmp.eq.s32.totalorder %v2099_v19, %v1898_v23  ;;  %vm480_vm5 = vcmp.eq.s32.totalorder %v2099_v19, %v1903_v26 }
 0x146   :  { %v721_v8 = vadd.f32 %v1406_v17, %v677_v34  ;;  %v722_v40 = vadd.f32 %v1407_v32, %v678_v35  ;;  %v1368_v56 = vsel %vm479_vm4, 1.0, %v1743_v29  ;;  %v1369_v58 = vsel %vm480_vm5, 1.0, %v1743_v29 }
 0x147   :  { %v503_v0 = vadd.f32 %v1368_v56, %v459_v22  ;;  %v504_v4 = vadd.f32 %v1369_v58, %v460_v59  ;;  %v550_v32 = vadd.f32 %v1379_v20, %v506_v13  ;;  %v1410_v11 = vsel %vm701_vm8, 1.0, %v1743_v29 }
 0x148   :  { %v2187_v30 = vpop.permute.xlu1 %561  ;;  %v765_v45 = vadd.f32 %v1414_v39, %v721_v8  ;;  %v766_v47 = vadd.f32 %v1415_v41, %v722_v40  ;;  %v1411_v50 = vsel %vm702_vm9, 1.0, %v1743_v29 }
 0x149   :  { %v547_v3 = vadd.f32 %v1376_v18, %v503_v0  ;;  %v548_v31 = vadd.f32 %v1377_v37, %v504_v4  ;;  %v1634_v0 = vld [vmem:[#allocation6 + $0x8] sm:$0xff]   ;;  %v1639_v18 = vld [vmem:[#allocation6 + $0x30] sm:$0xff]   ;;  %v1640_v37 = vld [vmem:[#allocation6 + $0x38] sm:$0xff]  }
 0x14a   :  { %1506 = vmatprep.subr.bf16.mxu1 %v1634_v0  ;;  %v1638_v4 = vld [vmem:[#allocation6 + $0x28] sm:$0xff]  }
 0x14b   :  { %v591_v39 = vadd.f32 %v1384_v24, %v547_v3  ;;  %v592_v41 = vadd.f32 %v1385_v27, %v548_v31  ;;  %1507 = vmatpush3.bf16.msra.mxu1 %v1634_v0 }
 0x14d   :  { %v729_v6 = vpop.permute.xlu1 %728 }
 0x14e   :  { %vm739_vm14 = vcmp.eq.s32.totalorder %v729_v6, %v1898_v23  ;;  %vm740_vm15 = vcmp.eq.s32.totalorder %v729_v6, %v1903_v26 }
 0x14f   :  { %v1412_v43 = vsel %vm739_vm14, 1.0, %v1743_v29  ;;  %v1413_v44 = vsel %vm740_vm15, 1.0, %v1743_v29  ;;  %vm569_vm14 = vcmp.eq.s32.totalorder %v2187_v30, %v1898_v23  ;;  %vm570_vm15 = vcmp.eq.s32.totalorder %v2187_v30, %v1903_v26 }
 0x150   :  { %v763_v16 = vadd.f32 %v1412_v43, %v719_v33  ;;  %v764_v46 = vadd.f32 %v1413_v44, %v720_v42  ;;  %v1386_v30 = vsel %vm569_vm14, 1.0, %v1743_v29  ;;  %v1387_v17 = vsel %vm570_vm15, 1.0, %v1743_v29 }
 0x151   :  { %v593_v7 = vadd.f32 %v1386_v30, %v549_v21  ;;  %v594_v5 = vadd.f32 %v1387_v17, %v550_v32 }
 0x152   :  { %v2233_v51 = vpop.permute.xlu1 %602  ;;  %v772_v52 = vpack.c.bf16 %v766_v47, %v764_v46  ;;  %v771_v53 = vpack.c.bf16 %v765_v45, %v763_v16  ;;  %v1400_v16 = vsel %vm655_vm6, 1.0, %v1743_v29  ;;  %v1401_v46 = vsel %vm656_vm7, 1.0, %v1743_v29 }
 0x153   :  { %vm611_vm2 = vcmp.eq.s32.totalorder %v2233_v51, %v1898_v23  ;;  %vm612_vm3 = vcmp.eq.s32.totalorder %v2233_v51, %v1903_v26 }
 0x154   :  { %935 = vmatprep.mubr.bf16.mxu0 %v772_v52  ;;  %v1392_v8 = vsel %vm611_vm2, 1.0, %v1743_v29  ;;  %v1393_v40 = vsel %vm612_vm3, 1.0, %v1743_v29 }
 0x155   :  { %936 = vmatmul.mubr.bf16.vlgmr.msra.gmra.mrb[0].mxu0 %v771_v53  ;;  %v635_v44 = vadd.f32 %v1392_v8, %v591_v39  ;;  %v636_v45 = vadd.f32 %v1393_v40, %v592_v41  ;;  %v1647_v8 = vld [vmem:[%s2381_s6 + $0x30] sm:$0xff]   ;;  %v1648_v40 = vld [vmem:[%s2381_s6 + $0x38] sm:$0xff]   ;;  %v1436_v41 = vld [vmem:[%s2378_s3] ss:$0 sm:$0xff] }
 0x156   :  { %v606_v19 = vpop.permute.xlu1 %605 }
 0x157   :  { %vm613_vm0 = vcmp.eq.s32.totalorder %v606_v19, %v1898_v23  ;;  %vm614_vm1 = vcmp.eq.s32.totalorder %v606_v19, %v1903_v26  ;;  %v679_v53 = vadd.f32 %v1400_v16, %v635_v44  ;;  %v680_v2 = vadd.f32 %v1401_v46, %v636_v45 }
 0x158   :  { %v1394_v34 = vsel %vm613_vm0, 1.0, %v1743_v29  ;;  %v1395_v35 = vsel %vm614_vm1, 1.0, %v1743_v29 }
 0x159   :  { %v637_v42 = vadd.f32 %v1394_v34, %v593_v7  ;;  %v638_v43 = vadd.f32 %v1395_v35, %v594_v5  ;;  %v1641_v34 = vld [vmem:[%s2381_s6] sm:$0xff]   ;;  %v1642_v35 = vld [vmem:[%s2381_s6 + $0x8] sm:$0xff]  }
 0x15a   :  { %1524 = vmatprep.subr.bf16.mxu0 %v1641_v34  ;;  %v1645_v7 = vld [vmem:[%s2381_s6 + $0x20] sm:$0xff]   ;;  %v1646_v5 = vld [vmem:[%s2381_s6 + $0x28] sm:$0xff]  }
 0x15b   :  { %v650_v15 = vpop.permute.xlu1 %649  ;;  %1525 = vmatpush3.bf16.msra.mxu0 %v1641_v34 }
 0x15c   :  { %vm657_vm4 = vcmp.eq.s32.totalorder %v650_v15, %v1898_v23  ;;  %vm658_vm5 = vcmp.eq.s32.totalorder %v650_v15, %v1903_v26  ;;  %1526 = vmatprep.subr.bf16.mxu0 %v1642_v35 }
 0x15d   :  { %v1402_v6 = vsel %vm657_vm4, 1.0, %v1743_v29  ;;  %v1403_v33 = vsel %vm658_vm5, 1.0, %v1743_v29 }
 0x15e   :  { %v681_v47 = vadd.f32 %v1402_v6, %v637_v42  ;;  %v682_v48 = vadd.f32 %v1403_v33, %v638_v43 }
 0x15f   :  { %1527 = vmatpush3.bf16.msra.mxu0 %v1642_v35 }
 0x160   :  { %v691_v38 = vpop.permute.xlu1 %690  ;;  %v725_v54 = vadd.f32 %v1410_v11, %v681_v47  ;;  %v726_v1 = vadd.f32 %v1411_v50, %v682_v48  ;;  %1528 = vmatprep.subr.bf16.mxu0 %v1643_v36 }
 0x161   :  { %vm699_vm10 = vcmp.eq.s32.totalorder %v691_v38, %v1898_v23  ;;  %vm700_vm11 = vcmp.eq.s32.totalorder %v691_v38, %v1903_v26  ;;  %v1644_v38 = vld [vmem:[%s2381_s6 + $0x18] sm:$0xff]  }
 0x162   :  { %v1408_v51 = vsel %vm699_vm10, 1.0, %v1743_v29  ;;  %v1409_v52 = vsel %vm700_vm11, 1.0, %v1743_v29 }
 0x163   :  { %v723_v9 = vadd.f32 %v1408_v51, %v679_v53  ;;  %v724_v12 = vadd.f32 %v1409_v52, %v680_v2  ;;  %1529 = vmatpush3.bf16.msra.mxu0 %v1643_v36 }
 0x164   :  { %1530 = vmatprep.subr.bf16.mxu0 %v1644_v38 }
 0x165   :  { %v735_v49 = vpop.permute.xlu1 %734 }
 0x166   :  { %vm743_vm12 = vcmp.eq.s32.totalorder %v735_v49, %v1898_v23  ;;  %vm744_vm13 = vcmp.eq.s32.totalorder %v735_v49, %v1903_v26 }
 0x167   :  { %v1416_v55 = vsel %vm743_vm12, 1.0, %v1743_v29  ;;  %v1417_v57 = vsel %vm744_vm13, 1.0, %v1743_v29  ;;  %1531 = vmatpush3.bf16.msra.mxu0 %v1644_v38  ;;  %v1447_v38 = vld [vmem:[%s2382_s7] ss:$0 sm:$0xff] }
 0x168   :  { %v767_v58 = vadd.f32 %v1416_v55, %v723_v9  ;;  %v768_v22 = vadd.f32 %v1417_v57, %v724_v12  ;;  %1532 = vmatprep.subr.bf16.mxu0 %v1645_v7 }
 0x169   :  { %v738_v14 = vpop.permute.xlu1 %737 }
 0x16a   :  { %vm745_vm14 = vcmp.eq.s32.totalorder %v738_v14, %v1898_v23  ;;  %vm746_vm15 = vcmp.eq.s32.totalorder %v738_v14, %v1903_v26  ;;  %v1635_v23 = vld [vmem:[#allocation6 + $0x10] sm:$0xff]   ;;  %v1636_v26 = vld [vmem:[#allocation6 + $0x18] sm:$0xff]  }
 0x16b   :  { %v1418_v19 = vsel %vm745_vm14, 1.0, %v1743_v29  ;;  %v1419_v56 = vsel %vm746_vm15, 1.0, %v1743_v29  ;;  %1508 = vmatprep.subr.bf16.mxu1 %v1635_v23  ;;  %v1637_v29 = vld [vmem:[#allocation6 + $0x20] sm:$0xff]   ;;  %1533 = vmatpush3.bf16.msra.mxu0 %v1645_v7 }
 0x16c   :  { %v769_v59 = vadd.f32 %v1418_v19, %v725_v54  ;;  %v770_v61 = vadd.f32 %v1419_v56, %v726_v1  ;;  %1509 = vmatpush3.bf16.msra.mxu1 %v1635_v23  ;;  %1534 = vmatprep.subr.bf16.mxu0 %v1646_v5 }
 0x16d   :  { %1510 = vmatprep.subr.bf16.mxu1 %v1636_v26 }
 0x16e   :  { %v774_v62 = vpack.c.bf16 %v770_v61, %v768_v22  ;;  %v773_v60 = vpack.c.bf16 %v769_v59, %v767_v58 }
 0x16f   :  { %1535 = vmatpush3.bf16.msra.mxu0 %v1646_v5 }
 0x170   :  { %943 = vmatprep.mubr.bf16.mxu0 %v774_v62  ;;  %1511 = vmatpush3.bf16.msra.mxu1 %v1636_v26 }
 0x171   :  { %944 = vmatmul.mubr.bf16.gmra.mrb[4].mxu0 %v773_v60  ;;  %1512 = vmatprep.subr.bf16.mxu1 %v1637_v29 }
 0x172   :  { %1536 = vmatprep.subr.bf16.mxu0 %v1647_v8 }
 0x173   :  { %1537 = vmatpush3.bf16.msra.mxu0 %v1647_v8 }
 0x174   :  { %1513 = vmatpush3.bf16.msra.mxu1 %v1637_v29  ;;  %1538 = vmatprep.subr.bf16.mxu0 %v1648_v40 }
 0x175   :  { %1514 = vmatprep.subr.bf16.mxu1 %v1638_v4 }
 0x177   :  { %1539 = vmatpush3.bf16.msra.mxu0 %v1648_v40 }
 0x178   :  { %1515 = vmatpush3.bf16.msra.mxu1 %v1638_v4  ;;  %v1445_v4 = vld [vmem:[%s2379_s4] ss:$0 sm:$0xff] }
 0x179   :  { %1516 = vmatprep.subr.bf16.mxu1 %v1639_v18 }
 0x17c   :  { %1517 = vmatpush3.bf16.msra.mxu1 %v1639_v18 }
 0x17d   :  { %1518 = vmatprep.subr.bf16.mxu1 %v1640_v37 }
 0x180   :  { %1519 = vmatpush3.bf16.msra.mxu1 %v1640_v37 }
 0x228   :  { %v1472_v10 = vpop.f32.mrb[0].mxu0 }
 0x229   :  { %v1473_v13 = vpop.f32.mrb[1].mxu0 }
 0x22a   :  { %v1474_v15 = vadd.f32 %v1473_v13, %v1472_v10  ;;  %v1475_v25 = vpop.f32.mrb[2].mxu0 }
 0x22b   :  { %v1476_v20 = vpop.f32.mrb[3].mxu0 }
 0x22c   :  { %v1477_v24 = vadd.f32 %v1476_v20, %v1475_v25 }
 0x22e   :  { %v952_v27 = vpack.c.bf16 %v1477_v24, %v1474_v15  ;;  %v1446_v15 = vld [vmem:[%s2380_s5] ss:$0 sm:$0xff]  ;;  %s1744_s5 = smov [#allocation8]  }
 0x22f   :  { %s1279_s2 = sshll.u32 %s1744_s5, 4  ;;  %s1280_s2 = int_to_ptr.vmem [resolvable:$true] %s1279_s2 }
 0x230   :  { %1520 = vmatprep.mubr.bf16.mxu1 %v952_v27  ;;  %s1695_s12 = scalar_lea.vmem %s1280_s2, 512  ;;  %p1700_p3 = scmp.lt.s32.totalorder %s1280_s2, %s1280_s2 }
 0x231   :  { %p1696_p2 = scmp.ne.s32.totalorder %s1280_s2, %s1695_s12  ;;  %p1701_p4 = scmp.lt.s32.totalorder %s1695_s12, %s1695_s12 }
 0x233   :  { %p1702_p5 = por %p1701_p4, %p1700_p3 }
 0x235   :  { %p1703_p6 = pnand %p1702_p5, %p1696_p2 }
 0x244   :  { %v1478_v28 = vpop.f32.mrb[4].mxu0 }
 0x245   :  { %v1479_v3 = vpop.f32.mrb[5].mxu0 }
 0x246   :  { %v1480_v31 = vadd.f32 %v1479_v3, %v1478_v28  ;;  %v1481_v30 = vpop.f32.mrb[6].mxu0 }
 0x247   :  { %v1482_v17 = vpop.f32.mrb[7].mxu0 }
 0x248   :  { %v1483_v21 = vadd.f32 %v1482_v17, %v1481_v30 }
 0x24a   :  { %v953_v32 = vpack.c.bf16 %v1483_v21, %v1480_v31 }
 0x24c   :  { %1521 = vmatmul.mubr.bf16.vlgmr.msra.gmra.mrb[0].mxu1 %v953_v32 }
 0x31f   :  { %v1522_v39 = vpop.f32.mrb[0].mxu1 }
 0x320   :  { %v1059_v6 = vpop.f32.mrb[1].mxu1  ;;  %v1068_v45 = vadd.f32 %v1522_v39, %v1436_v41 }
 0x321   :  { %v1523_v33 = vpop.f32.mrb[2].mxu1  ;;  %v1060_v43 = vadd.f32 %v1436_v41, %v1059_v6 }
 0x322   :  { %v1062_v42 = vpop.f32.mrb[3].mxu1  ;;  %v1071_v46 = vadd.f32 %v1523_v33, %v1436_v41 }
 0x323   :  { %v1063_v44 = vadd.f32 %v1436_v41, %v1062_v42 }
 0x325   :  { %v1087_v16 = vadd.f32 %v1063_v44, %v1060_v43 }
 0x327   :  { %v1088_v47 = vadd.f32 %v1087_v16, %v1068_v45 }
 0x329   :  { %v1089_v48 = vadd.f32 %v1088_v47, %v1071_v46 }
 0x32b   :  { %v1090_v49 = vrot.slane %v1089_v48, 4 }
 0x32d   :  { %v1091_v11 = vadd.f32 %v1090_v49, %v1089_v48 }
 0x32f   :  { %v1092_v50 = vrot.slane %v1091_v11, 2 }
 0x331   :  { %v1093_v51 = vadd.f32 %v1092_v50, %v1091_v11 }
 0x333   :  { %v1094_v52 = vrot.slane %v1093_v51, 1 }
 0x335   :  { %v1095_v53 = vadd.f32 %v1094_v52, %v1093_v51 }
 0x337   :  { %v1097_v2 = vmul.f32 0.03125, %v1095_v53 }
 0x339   :  { %v1098_v54 = vsub.f32 %v1060_v43, %v1097_v2  ;;  %v1099_v1 = vsub.f32 %v1063_v44, %v1097_v2  ;;  %v1100_v55 = vsub.f32 %v1068_v45, %v1097_v2  ;;  %v1101_v57 = vsub.f32 %v1071_v46, %v1097_v2 }
 0x33b   :  { %v1102_v14 = vmul.f32 %v1098_v54, %v1098_v54  ;;  %v1103_v9 = vmul.f32 %v1099_v1, %v1099_v1  ;;  %v1104_v12 = vmul.f32 %v1100_v55, %v1100_v55  ;;  %v1105_v56 = vmul.f32 %v1101_v57, %v1101_v57 }
 0x33d   :  { %v1106_v19 = vadd.f32 %v1103_v9, %v1102_v14 }
 0x33f   :  { %v1107_v58 = vadd.f32 %v1106_v19, %v1104_v12 }
 0x341   :  { %v1108_v22 = vadd.f32 %v1107_v58, %v1105_v56 }
 0x343   :  { %v1109_v59 = vrot.slane %v1108_v22, 4 }
 0x345   :  { %v1110_v61 = vadd.f32 %v1109_v59, %v1108_v22 }
 0x347   :  { %v1111_v62 = vrot.slane %v1110_v61, 2 }
 0x349   :  { %v1112_v60 = vadd.f32 %v1111_v62, %v1110_v61 }
 0x34b   :  { %v1113_v63 = vrot.slane %v1112_v60, 1 }
 0x34d   :  { %v1114_v0 = vadd.f32 %v1113_v63, %v1112_v60 }
 0x34f   :  { %v1115_v23 = vmul.f32 0.03125, %v1114_v0 }
 0x351   :  { %v1116_v26 = vadd.f32 1e-05, %v1115_v23 }
 0x353   :  { %1649 = vrsqrt.f32 %v1116_v26 }
 0x35d   :  { %v1650_v29 = vpop.eup %1649 }
 0x35e   :  { %v1119_v18 = vmul.f32 %v1650_v29, %v1099_v1  ;;  %v1120_v37 = vmul.f32 %v1650_v29, %v1100_v55  ;;  %v1121_v10 = vmul.f32 %v1650_v29, %v1101_v57  ;;  %v1118_v13 = vmul.f32 %v1650_v29, %v1098_v54 }
 0x360   :  { %v1130_v25 = vmul.f32 %v1445_v4, %v1119_v18  ;;  %v1131_v20 = vmul.f32 %v1445_v4, %v1120_v37  ;;  %v1132_v24 = vmul.f32 %v1445_v4, %v1121_v10  ;;  %v1129_v27 = vmul.f32 %v1445_v4, %v1118_v13 }
 0x362   :  { %v1140_v28 = vadd.f32 %v1446_v15, %v1129_v27  ;;  %v1141_v3 = vadd.f32 %v1446_v15, %v1130_v25  ;;  %v1142_v31 = vadd.f32 %v1446_v15, %v1131_v20  ;;  %v1143_v30 = vadd.f32 %v1446_v15, %v1132_v24 }
 0x364   :  { %v1144_v17 = vmax.f32 %v1140_v28, 0.0  ;;  %v1145_v21 = vmax.f32 %v1141_v3, 0.0  ;;  %v1146_v32 = vmax.f32 %v1142_v31, 0.0  ;;  %v1147_v34 = vmax.f32 %v1143_v30, 0.0 }
 0x366   :  { %v1148_v35 = vpack.c.bf16 %v1145_v21, %v1144_v17  ;;  %v1149_v36 = vpack.c.bf16 %v1147_v34, %v1146_v32 }
 0x368   :  { %1540 = vmatprep.mubr.bf16.mxu0 %v1148_v35 }
 0x369   :  { %1541 = vmatmul.mubr.bf16.vlgmr.msra.gmra.mrb[8].mxu0 %v1149_v36 }
 0x43c   :  { %v1542_v7 = vpop.f32.mrb[8].mxu0 }
 0x43d   :  { %v1264_v5 = vadd.f32 %v1542_v7, %v1447_v38  ;;  %v1255_v8 = vpop.f32.mrb[9].mxu0 }
 0x43e   :  { %v1256_v40 = vadd.f32 %v1447_v38, %v1255_v8  ;;  %v1543_v39 = vpop.f32.mrb[10].mxu0 }
 0x43f   :  { %1272 = vst [vmem:[#allocation8 + $0x10] sm:$0xff] %v1264_v5  ;;  %v1267_v41 = vadd.f32 %v1543_v39, %v1447_v38  ;;  %v1258_v6 = vpop.f32.mrb[11].mxu0 }
 0x440   :  { %1270 = vst [vmem:[#allocation8] sm:$0xff] %v1256_v40  ;;  %v1259_v33 = vadd.f32 %v1447_v38, %v1258_v6 }
 0x441   :  { %1273 = vst [vmem:[#allocation8 + $0x18] sm:$0xff] %v1267_v41 }
 0x442   :  { %1271 = vst [vmem:[#allocation8 + $0x8] sm:$0xff] %v1259_v33 }
 0x443   :  { %1706 = shalt.err (!%p1703_p6)
}
 0x444   :  { %s1707_s14 = scalar_lea.hbm %s2383_s8, 512 }
 0x445   :  { %p1708_p7 = scmp.ne.s32.totalorder %s2383_s8, %s1707_s14  ;;  %p1711_p8 = scmp.lt.u32.totalorder %s1707_s14, %s2383_s8 }
 0x447   :  { %p1713_p9 = pnand %p1711_p8, %p1708_p7 }
 0x449   :  { %1716 = shalt.err (!%p1713_p9)
}
 0x44a   :  { %s1745_s18 = smov 128   ;;  %s1746_s19 = smov 8  }
 0x44b   :  { %1285 = dma.vmem_to_hbm [thread:$0]  %s1280_s2, 512, %s2383_s8, [#allocation5], %s1745_s18, %s1745_s18, %s1746_s19  }
 0x44c   :  { %1721 = dma.done.wait [#allocation5], 512  }
 0x44d   :  { %1722 = vsyncadd [#allocation5], 4294966784 }
 0x44e   :  { %1289 = vsyncpa [#allocation4], 1 }
 0x44f   :  { %1290 = vsyncpa [#allocation7], 1 }
 0x450   :  { %1291 = vsyncpa [#allocation5], 1 }

</bundles_post_ra>
